<compile_context>
chip_gen: v6e
topology: v6e:2x2x1
jax: 0.10.0
libtpu: 0.0.40
codegen_flags: <defaults>
</compile_context>

<pallas_src>
import functools
import math

import jax
import jax.numpy as jnp
from jax.experimental import pallas as pl
from jax.experimental.pallas import tpu as pltpu

LANE = 128  # TPU lane width; every padded feature dim is a multiple of this.


def _round_up(x, m):
    return (x + m - 1) // m * m


# ---------------- in-kernel helpers (pure value math, all f32) ----------------
def _ln_padded(x, g, b, n_real):
    """LayerNorm over the first `n_real` columns of a zero-padded (rows, 128k) slab.

    Invariant: x[:, n_real:] == 0 (maintained by zero-padded weights/biases), so sums over the
    full padded axis equal sums over the real columns; g/b are zero beyond n_real, so the
    output stays zero-padded.
    """
    inv_n = 1.0 / n_real
    mu = jnp.sum(x, axis=-1, keepdims=True) * inv_n
    ex2 = jnp.sum(x * x, axis=-1, keepdims=True) * inv_n
    var = ex2 - mu * mu
    return (x - mu) * jax.lax.rsqrt(var + 1e-12) * g + b


def _gelu(x):
    # TODO(synk): tanh-approximate GELU; HF BERT default is exact erf-GELU (small drift).
    return 0.5 * x * (1.0 + jnp.tanh(0.7978845608028654 * (x + 0.044715 * x * x * x)))


# ---------------- fused encoder + pooler + regressor kernel ----------------
def _encoder_kernel(h0_hbm, mask_ref,
                    wqkv_ref, bqkv_ref, wo_ref, bo_ref, ln1g_ref, ln1b_ref,
                    w1_ref, b1_ref, w2_ref, b2_ref, ln2g_ref, ln2b_ref,
                    poolw_ref, poolb_ref, regw_ref, regb_ref,
                    out_ref,
                    h_ref, dma_sem,
                    *, Bt, S, Hn, DP, H, L):
    """One grid step = (batch tile bt, encoder layer l).  The activation slab (Bt*S, Hp) lives
    in a VMEM scratch across all layer steps of a batch tile; per-layer weights stream in."""
    bt = pl.program_id(0)
    l = pl.program_id(1)
    HD = Hn * DP  # padded width of Q (== K == V) with one 128-lane group per head

    # Layer 0: DMA this tile's (already embedding-LayerNormed, zero-padded) activations from
    # HBM into the resident scratch -- the emb slab is never VMEM-resident across the grid.
    @pl.when(l == 0)
    def _():
        cp = pltpu.make_async_copy(h0_hbm.at[bt], h_ref, dma_sem)
        cp.start()
        cp.wait()

    h = h_ref[...]                                                       # (Bt*S, Hp) f32

    # --- fused QKV projection: one (Hp, 3*HD) bf16 matmul, f32 accumulate ---
    qkv = jnp.dot(h.astype(wqkv_ref.dtype), wqkv_ref[...],
                  preferred_element_type=jnp.float32) + bqkv_ref[...]    # (Bt*S, 3*HD)

    # --- additive attention-mask bias built in-kernel from the tiny (Bt, S) mask ---
    bias = (1.0 - mask_ref[...]) * -1e9                                  # (Bt, S)
    bias = jnp.concatenate([bias[:, None, :]] * Hn, axis=0)              # (Hn*Bt, 1, S)

    # --- multi-head attention as ONE batched einsum over (head, example) ---
    # Heads are 128-lane-aligned groups, so these slices/reshapes never cut an (8,128) tile;
    # the small Python loop only repacks lanes -> batch, all MXU work is a single batched dot.
    # 1/sqrt(Dh) is folded into wq/bq at pack time.
    def to_batched(x2d):                                                 # (Bt*S, HD)->(Hn*Bt,S,DP)
        return jnp.concatenate(
            [x2d[:, hh * DP:(hh + 1) * DP].reshape(Bt, S, DP) for hh in range(Hn)], axis=0)

    q = to_batched(qkv[:, 0:HD])
    k = to_batched(qkv[:, HD:2 * HD])
    v = to_batched(qkv[:, 2 * HD:3 * HD])

    s = jnp.einsum('bqd,bkd->bqk', q, k, preferred_element_type=jnp.float32) + bias
    m = jnp.max(s, axis=-1, keepdims=True)
    p = jnp.exp(s - m)
    p = p * pl.reciprocal(jnp.sum(p, axis=-1, keepdims=True), approx=True)
    ctx = jnp.einsum('bqk,bkd->bqd', p, v, preferred_element_type=jnp.float32)  # (Hn*Bt,S,DP)

    # back to token-major rows x lane-major heads: (Bt*S, HD), lane-aligned concat
    ctx = jnp.concatenate(
        [ctx[hh * Bt:(hh + 1) * Bt].reshape(Bt * S, DP) for hh in range(Hn)], axis=-1)

    # --- output projection + residual + LayerNorm ---
    attn = jnp.dot(ctx.astype(wo_ref.dtype), wo_ref[...],
                   preferred_element_type=jnp.float32) + bo_ref[...]
    h = _ln_padded(attn + h, ln1g_ref[...], ln1b_ref[...], H)

    # --- FFN + residual + LayerNorm (GELU/LN in f32; only matmul operands are bf16) ---
    ff = jnp.dot(h.astype(w1_ref.dtype), w1_ref[...],
                 preferred_element_type=jnp.float32) + b1_ref[...]
    ff = _gelu(ff)
    ff = jnp.dot(ff.astype(w2_ref.dtype), w2_ref[...],
                 preferred_element_type=jnp.float32) + b2_ref[...]
    h = _ln_padded(ff + h, ln2g_ref[...], ln2b_ref[...], H)

    h_ref[...] = h

    # --- last layer: CLS pooler (tanh) + regression head for this batch tile ---
    @pl.when(l == L - 1)
    def _():
        cls = h_ref[pl.ds(0, Bt, stride=S)]                              # strided CLS gather (Bt, Hp)
        pooled = jnp.tanh(jnp.dot(cls, poolw_ref[...],
                                  preferred_element_type=jnp.float32) + poolb_ref[...])
        out_ref[...] = (jnp.dot(pooled, regw_ref[...],
                                preferred_element_type=jnp.float32) + regb_ref[...])  # (Bt, 128)


# ---------------- parameters ----------------
def init_params(key, cfg):
    H, F, V, P, L = cfg["hidden"], cfg["ffn"], cfg["vocab"], cfg["max_pos"], cfg["layers"]
    keys = iter(jax.random.split(key, 64))

    def w(shape):
        return 0.02 * jax.random.normal(next(keys), shape, jnp.float32)

    def zeros(n):
        return jnp.zeros((n,), jnp.float32)

    params = {
        "word_emb": w((V, H)), "pos_emb": w((P, H)), "type_emb": w((2, H)),
        "emb_ln_g": jnp.ones((H,), jnp.float32), "emb_ln_b": zeros(H),
        "pool_w": w((H, H)), "pool_b": zeros(H),
        "reg_w": w((H, 1)), "reg_b": zeros(1),
        "layers": [],
    }
    for _ in range(L):
        params["layers"].append({
            "wq": w((H, H)), "bq": zeros(H),
            "wk": w((H, H)), "bk": zeros(H),
            "wv": w((H, H)), "bv": zeros(H),
            "wo": w((H, H)), "bo": zeros(H),
            "ln1_g": jnp.ones((H,), jnp.float32), "ln1_b": zeros(H),
            "w1": w((H, F)), "b1": zeros(F),
            "w2": w((F, H)), "b2": zeros(H),
            "ln2_g": jnp.ones((H,), jnp.float32), "ln2_b": zeros(H),
        })
    return params


def pack_params(params, cfg):
    """Pad every feature dim to multiples of 128 lanes, give each head its own 128-lane group,
    fold 1/sqrt(Dh) into wq/bq, stack per-layer weights on a leading layer axis, and cast the
    big streamed matmul weights to bf16 (biases / LN params stay f32)."""
    H, F, L, Hn = cfg["hidden"], cfg["ffn"], cfg["layers"], cfg["heads"]
    Dh = H // Hn
    Hp = _round_up(H, LANE)
    Fp = _round_up(F, LANE)
    DP = _round_up(Dh, LANE)          # padded per-head width (lane-aligned head groups)
    HD = Hn * DP
    scale = 1.0 / math.sqrt(Dh)

    def pad_mat(w_, rows, cols):
        return jnp.zeros((rows, cols), jnp.float32).at[:w_.shape[0], :w_.shape[1]].set(w_)

    def pad_row(v, cols):
        return jnp.zeros((1, cols), jnp.float32).at[0, :v.shape[0]].set(v)

    def pack_qkv(lyr):
        w_ = jnp.zeros((Hp, 3 * HD), jnp.float32)
        b_ = jnp.zeros((1, 3 * HD), jnp.float32)
        for hh in range(Hn):
            c = hh * Dh
            w_ = w_.at[:H, hh * DP:hh * DP + Dh].set(lyr["wq"][:, c:c + Dh] * scale)
            w_ = w_.at[:H, HD + hh * DP:HD + hh * DP + Dh].set(lyr["wk"][:, c:c + Dh])
            w_ = w_.at[:H, 2 * HD + hh * DP:2 * HD + hh * DP + Dh].set(lyr["wv"][:, c:c + Dh])
            b_ = b_.at[0, hh * DP:hh * DP + Dh].set(lyr["bq"][c:c + Dh] * scale)
            b_ = b_.at[0, HD + hh * DP:HD + hh * DP + Dh].set(lyr["bk"][c:c + Dh])
            b_ = b_.at[0, 2 * HD + hh * DP:2 * HD + hh * DP + Dh].set(lyr["bv"][c:c + Dh])
        return w_, b_

    def pack_wo(lyr):
        w_ = jnp.zeros((HD, Hp), jnp.float32)
        for hh in range(Hn):
            w_ = w_.at[hh * DP:hh * DP + Dh, :H].set(lyr["wo"][hh * Dh:(hh + 1) * Dh, :])
        return w_

    layers = params["layers"]
    qkv_packed = [pack_qkv(lyr) for lyr in layers]

    def stack(arrs, dtype=jnp.float32):
        return jnp.stack(arrs, axis=0).astype(dtype)

    return {
        "word_emb": params["word_emb"], "pos_emb": params["pos_emb"],
        "type_emb": params["type_emb"],
        "emb_ln_g": params["emb_ln_g"], "emb_ln_b": params["emb_ln_b"],
        "wqkv": stack([wb[0] for wb in qkv_packed], jnp.bfloat16),    # (L, Hp, 3*HD)
        "bqkv": stack([wb[1] for wb in qkv_packed]),                  # (L, 1, 3*HD)
        "wo": stack([pack_wo(lyr) for lyr in layers], jnp.bfloat16),  # (L, HD, Hp)
        "bo": stack([pad_row(lyr["bo"], Hp) for lyr in layers]),
        "ln1_g": stack([pad_row(lyr["ln1_g"], Hp) for lyr in layers]),
        "ln1_b": stack([pad_row(lyr["ln1_b"], Hp) for lyr in layers]),
        "w1": stack([pad_mat(lyr["w1"], Hp, Fp) for lyr in layers], jnp.bfloat16),
        "b1": stack([pad_row(lyr["b1"], Fp) for lyr in layers]),
        "w2": stack([pad_mat(lyr["w2"], Fp, Hp) for lyr in layers], jnp.bfloat16),
        "b2": stack([pad_row(lyr["b2"], Hp) for lyr in layers]),
        "ln2_g": stack([pad_row(lyr["ln2_g"], Hp) for lyr in layers]),
        "ln2_b": stack([pad_row(lyr["ln2_b"], Hp) for lyr in layers]),
        "pool_w": pad_mat(params["pool_w"], Hp, Hp),
        "pool_b": pad_row(params["pool_b"], Hp),
        "reg_w": pad_mat(params["reg_w"], Hp, LANE),                  # lane-dense final store
        "reg_b": pad_row(params["reg_b"], LANE),
    }


# -------- forward (mirrors BertRegressionModel.forward, non-roberta / pooler path) --------
def bert_regression_forward(packed, input_ids, attention_mask, cfg, *, num_batch_tiles=None):
    B, S = input_ids.shape
    H, Hn, L, F = cfg["hidden"], cfg["heads"], cfg["layers"], cfg["ffn"]
    Dh = H // Hn
    Hp, Fp, DP = _round_up(H, LANE), _round_up(F, LANE), _round_up(Dh, LANE)
    HD = Hn * DP

    # Leading "parallel" batch-tile axis: lets v7x's two TensorCores split the batch
    # (per-layer weights are restreamed per tile; irrelevant at this scale).
    BT = num_batch_tiles if num_batch_tiles is not None else min(B, 2)
    assert B % BT == 0
    Bt = B // BT                      # examples per tile
    R = Bt * S                        # activation rows per tile

    # ---- embeddings + embedding LayerNorm: table gathers are glue, done in plain JAX ----
    emb = (packed["word_emb"][input_ids]
           + packed["pos_emb"][jnp.arange(S)][None, :, :]
           + packed["type_emb"][0][None, None, :]).astype(jnp.float32)        # (B, S, H)
    mu = jnp.mean(emb, axis=-1, keepdims=True)
    var = jnp.mean((emb - mu) ** 2, axis=-1, keepdims=True)
    emb = (emb - mu) * jax.lax.rsqrt(var + 1e-12) * packed["emb_ln_g"] + packed["emb_ln_b"]
    # zero-pad hidden to Hp lanes and split into batch tiles; kernel DMAs tile bt at layer 0
    h0 = jnp.pad(emb, ((0, 0), (0, 0), (0, Hp - H))).reshape(BT, R, Hp)

    mask3 = attention_mask.astype(jnp.float32).reshape(BT, Bt, S)

    kernel = functools.partial(_encoder_kernel, Bt=Bt, S=S, Hn=Hn, DP=DP, H=H, L=L)

    per_layer3 = lambda bt, l: (l, 0, 0)
    per_tile3 = lambda bt, l: (bt, 0, 0)
    const2 = lambda bt, l: (0, 0)

    flops_layer = (2 * R * Hp * 3 * HD + 2 * R * HD * Hp + 2 * R * Hp * Fp + 2 * R * Fp * Hp
                   + 4 * Hn * Bt * S * S * DP)
    cost = pl.CostEstimate(
        flops=BT * (L * flops_layer + 2 * Bt * Hp * Hp + 2 * Bt * Hp * LANE),
        transcendentals=BT * (L * (Hn * Bt * S * S + R * Fp) + Bt * Hp),
        bytes_accessed=int(BT * L * (Hp * 3 * HD + HD * Hp + Hp * Fp + Fp * Hp) * 2
                           + h0.size * 4 + mask3.size * 4 + B * LANE * 4),
    )

    out = pl.pallas_call(
        kernel,
        out_shape=jax.ShapeDtypeStruct((BT, Bt, LANE), jnp.float32),
        grid=(BT, L),
        in_specs=[
            pl.BlockSpec(memory_space=pl.ANY),               # h0: stays in HBM, DMA'd at l==0
            pl.BlockSpec((None, Bt, S), per_tile3),          # attention mask (tiny, per tile)
            pl.BlockSpec((None, Hp, 3 * HD), per_layer3),    # wqkv (bf16)
            pl.BlockSpec((None, 1, 3 * HD), per_layer3),     # bqkv
            pl.BlockSpec((None, HD, Hp), per_layer3),        # wo   (bf16)
            pl.BlockSpec((None, 1, Hp), per_layer3),         # bo
            pl.BlockSpec((None, 1, Hp), per_layer3),         # ln1 gamma
            pl.BlockSpec((None, 1, Hp), per_layer3),         # ln1 beta
            pl.BlockSpec((None, Hp, Fp), per_layer3),        # w1   (bf16)
            pl.BlockSpec((None, 1, Fp), per_layer3),         # b1
            pl.BlockSpec((None, Fp, Hp), per_layer3),        # w2   (bf16)
            pl.BlockSpec((None, 1, Hp), per_layer3),         # b2
            pl.BlockSpec((None, 1, Hp), per_layer3),         # ln2 gamma
            pl.BlockSpec((None, 1, Hp), per_layer3),         # ln2 beta
            pl.BlockSpec((Hp, Hp), const2),                  # pool_w
            pl.BlockSpec((1, Hp), const2),                   # pool_b
            pl.BlockSpec((Hp, LANE), const2),                # reg_w (lane-padded)
            pl.BlockSpec((1, LANE), const2),                 # reg_b (lane-padded)
        ],
        out_specs=pl.BlockSpec((None, Bt, LANE), per_tile3),
        scratch_shapes=[
            pltpu.VMEM((R, Hp), jnp.float32),                # resident activation slab
            pltpu.SemaphoreType.DMA(()),                     # h0 DMA completion
        ],
        compiler_params=pltpu.CompilerParams(
            dimension_semantics=("parallel", "arbitrary"),   # batch tiles parallel, layers sequential
            vmem_limit_bytes=64 * 1024 * 1024),
        cost_estimate=cost,
    )(h0, mask3,
      packed["wqkv"], packed["bqkv"], packed["wo"], packed["bo"],
      packed["ln1_g"], packed["ln1_b"], packed["w1"], packed["b1"],
      packed["w2"], packed["b2"], packed["ln2_g"], packed["ln2_b"],
      packed["pool_w"], packed["pool_b"], packed["reg_w"], packed["reg_b"])

    return out.reshape(B, LANE)[:, 0]                        # Linear(H, 1).squeeze(-1)


if __name__ == "__main__":
    cfg = dict(vocab=128, max_pos=16, hidden=32, heads=2, ffn=64, layers=2)
    B, S = 2, 8

    key = jax.random.PRNGKey(0)
    pkey, ikey = jax.random.split(key)
    params = init_params(pkey, cfg)
    packed = pack_params(params, cfg)

    input_ids = jax.random.randint(ikey, (B, S), 0, cfg["vocab"], dtype=jnp.int32)
    attention_mask = jnp.array([[1] * S, [1] * (S - 2) + [0] * 2], dtype=jnp.int32)

    fwd = jax.jit(lambda p, ids, m: bert_regression_forward(p, ids, m, cfg))
    out = fwd(packed, input_ids, attention_mask)
    jax.block_until_ready(out)
    assert out.shape == (B,) and out.dtype == jnp.float32
    assert bool(jnp.all(jnp.isfinite(out)))
    print("KERNEL_OK")
</pallas_src>

<mosaic_0001>
module attributes {stable_mosaic.version = 11 : i64} {
  func.func @_encoder_kernel(%arg0: i32, %arg1: i32, %arg2: memref<2x8x128xf32, #tpu.memory_space<any>>, %arg3: memref<1x1x8xf32, #tpu.memory_space<vmem>>, %arg4: memref<1x128x768xbf16, #tpu.memory_space<vmem>>, %arg5: memref<1x1x768xf32, #tpu.memory_space<vmem>>, %arg6: memref<1x256x128xbf16, #tpu.memory_space<vmem>>, %arg7: memref<1x1x128xf32, #tpu.memory_space<vmem>>, %arg8: memref<1x1x128xf32, #tpu.memory_space<vmem>>, %arg9: memref<1x1x128xf32, #tpu.memory_space<vmem>>, %arg10: memref<1x128x128xbf16, #tpu.memory_space<vmem>>, %arg11: memref<1x1x128xf32, #tpu.memory_space<vmem>>, %arg12: memref<1x128x128xbf16, #tpu.memory_space<vmem>>, %arg13: memref<1x1x128xf32, #tpu.memory_space<vmem>>, %arg14: memref<1x1x128xf32, #tpu.memory_space<vmem>>, %arg15: memref<1x1x128xf32, #tpu.memory_space<vmem>>, %arg16: memref<128x128xf32, #tpu.memory_space<vmem>>, %arg17: memref<1x128xf32, #tpu.memory_space<vmem>>, %arg18: memref<128x128xf32, #tpu.memory_space<vmem>>, %arg19: memref<1x128xf32, #tpu.memory_space<vmem>>, %arg20: memref<1x1x128xf32, #tpu.memory_space<vmem>>, %arg21: memref<8x128xf32, #tpu.memory_space<vmem>>, %arg22: memref<!tpu.dma_semaphore, #tpu.memory_space<semaphore_mem>>) attributes {dimension_semantics = [#tpu.dimension_semantics<parallel>, #tpu.dimension_semantics<arbitrary>], iteration_bounds = array<i64: 2, 2>, scalar_prefetch = 0 : i64, scratch_operands = 2 : i64, tpu.core_type = #tpu.core_type<tc>, window_params = [{}, {transform_indices = @transform_1, window_bounds = array<i64: 1, 1, 8>}, {transform_indices = @transform_2, window_bounds = array<i64: 1, 128, 768>}, {transform_indices = @transform_3, window_bounds = array<i64: 1, 1, 768>}, {transform_indices = @transform_4, window_bounds = array<i64: 1, 256, 128>}, {transform_indices = @transform_5, window_bounds = array<i64: 1, 1, 128>}, {transform_indices = @transform_6, window_bounds = array<i64: 1, 1, 128>}, {transform_indices = @transform_7, window_bounds = array<i64: 1, 1, 128>}, {transform_indices = @transform_8, window_bounds = array<i64: 1, 128, 128>}, {transform_indices = @transform_9, window_bounds = array<i64: 1, 1, 128>}, {transform_indices = @transform_10, window_bounds = array<i64: 1, 128, 128>}, {transform_indices = @transform_11, window_bounds = array<i64: 1, 1, 128>}, {transform_indices = @transform_12, window_bounds = array<i64: 1, 1, 128>}, {transform_indices = @transform_13, window_bounds = array<i64: 1, 1, 128>}, {pipeline_mode = #tpu.pipeline_mode<synchronous>, transform_indices = @transform_14, window_bounds = array<i64: 128, 128>}, {pipeline_mode = #tpu.pipeline_mode<synchronous>, transform_indices = @transform_15, window_bounds = array<i64: 1, 128>}, {pipeline_mode = #tpu.pipeline_mode<synchronous>, transform_indices = @transform_16, window_bounds = array<i64: 128, 128>}, {pipeline_mode = #tpu.pipeline_mode<synchronous>, transform_indices = @transform_17, window_bounds = array<i64: 1, 128>}, {transform_indices = @transform_18, window_bounds = array<i64: 1, 1, 128>}]} {
    %c0_i32 = arith.constant 0 : i32
    %0 = arith.cmpi eq, %arg1, %c0_i32 : i32
    %1 = arith.extui %0 : i1 to i32
    %c0_i32_0 = arith.constant 0 : i32
    %2 = arith.cmpi ne, %1, %c0_i32_0 : i32
    scf.if %2 {
      %c0_i32_67 = arith.constant 0 : i32
      %c0_i32_68 = arith.constant 0 : i32
      %152 = tpu.memref_slice %arg2[%arg0, %c0_i32_67, %c0_i32_68] : memref<2x8x128xf32, #tpu.memory_space<any>> -> memref<1x8x128xf32, #tpu.memory_space<any>>
      %153 = tpu.memref_squeeze %152 : memref<1x8x128xf32, #tpu.memory_space<any>> -> memref<8x128xf32, #tpu.memory_space<any>>
      tpu.enqueue_dma source(%153 : memref<8x128xf32, #tpu.memory_space<any>>) target(%arg21 : memref<8x128xf32, #tpu.memory_space<vmem>>) target_semaphore(%arg22 : memref<!tpu.dma_semaphore, #tpu.memory_space<semaphore_mem>>)
      %c0_i32_69 = arith.constant 0 : i32
      %c0_i32_70 = arith.constant 0 : i32
      %154 = tpu.memref_slice %arg2[%arg0, %c0_i32_69, %c0_i32_70] : memref<2x8x128xf32, #tpu.memory_space<any>> -> memref<1x8x128xf32, #tpu.memory_space<any>>
      %155 = tpu.memref_squeeze %154 : memref<1x8x128xf32, #tpu.memory_space<any>> -> memref<8x128xf32, #tpu.memory_space<any>>
      tpu.wait_dma2 semaphore(%arg22 : memref<!tpu.dma_semaphore, #tpu.memory_space<semaphore_mem>>) src(%155 : memref<8x128xf32, #tpu.memory_space<any>>) dst(%arg21 : memref<8x128xf32, #tpu.memory_space<vmem>>)
    } else {
    }
    %c0 = arith.constant 0 : index
    %c0_1 = arith.constant 0 : index
    %3 = vector.load %arg21[%c0, %c0_1] : memref<8x128xf32, #tpu.memory_space<vmem>>, vector<8x128xf32>
    %4 = arith.truncf %3 : vector<8x128xf32> to vector<8x128xbf16>
    %c0_2 = arith.constant 0 : index
    %c0_3 = arith.constant 0 : index
    %c0_4 = arith.constant 0 : index
    %5 = vector.load %arg4[%c0_2, %c0_3, %c0_4] : memref<1x128x768xbf16, #tpu.memory_space<vmem>>, vector<1x128x768xbf16>
    %6 = vector.shape_cast %5 : vector<1x128x768xbf16> to vector<128x768xbf16>
    %cst = arith.constant dense<0.000000e+00> : vector<8x768xf32>
    %7 = tpu.matmul %4, %6, %cst {dimension_numbers = #tpu.dot_dimension_numbers<[1], [0], [0], [1], [0, 0, 1, 1], [], []>} : vector<8x128xbf16>, vector<128x768xbf16>, vector<8x768xf32> -> vector<8x768xf32>
    %c0_5 = arith.constant 0 : index
    %c0_6 = arith.constant 0 : index
    %c0_7 = arith.constant 0 : index
    %8 = vector.load %arg5[%c0_5, %c0_6, %c0_7] : memref<1x1x768xf32, #tpu.memory_space<vmem>>, vector<1x1x768xf32>
    %9 = vector.shape_cast %8 : vector<1x1x768xf32> to vector<1x768xf32>
    %10 = vector.broadcast %9 : vector<1x768xf32> to vector<8x768xf32>
    %11 = arith.addf %7, %10 : vector<8x768xf32>
    %c0_8 = arith.constant 0 : index
    %c0_9 = arith.constant 0 : index
    %c0_10 = arith.constant 0 : index
    %12 = vector.load %arg3[%c0_8, %c0_9, %c0_10] : memref<1x1x8xf32, #tpu.memory_space<vmem>>, vector<1x1x8xf32>
    %13 = vector.shape_cast %12 : vector<1x1x8xf32> to vector<1x8xf32>
    %cst_11 = arith.constant 1.000000e+00 : f32
    %14 = vector.broadcast %cst_11 : f32 to vector<1x8xf32>
    %15 = arith.subf %14, %13 : vector<1x8xf32>
    %cst_12 = arith.constant -1.000000e+09 : f32
    %16 = vector.broadcast %cst_12 : f32 to vector<1x8xf32>
    %17 = arith.mulf %15, %16 : vector<1x8xf32>
    %18 = vector.shape_cast %17 : vector<1x8xf32> to vector<1x1x8xf32>
    %19 = tpu.concatenate %18, %18 in 0 : vector<1x1x8xf32>, vector<1x1x8xf32> -> vector<2x1x8xf32>
    %20 = vector.extract_strided_slice %11 {offsets = [0, 0], sizes = [8, 256], strides = [1, 1]} : vector<8x768xf32> to vector<8x256xf32>
    %21 = vector.extract_strided_slice %20 {offsets = [0, 0], sizes = [8, 128], strides = [1, 1]} : vector<8x256xf32> to vector<8x128xf32>
    %22 = vector.shape_cast %21 : vector<8x128xf32> to vector<1x8x128xf32>
    %23 = vector.extract_strided_slice %20 {offsets = [0, 128], sizes = [8, 128], strides = [1, 1]} : vector<8x256xf32> to vector<8x128xf32>
    %24 = vector.shape_cast %23 : vector<8x128xf32> to vector<1x8x128xf32>
    %25 = tpu.concatenate %22, %24 in 0 : vector<1x8x128xf32>, vector<1x8x128xf32> -> vector<2x8x128xf32>
    %26 = vector.extract_strided_slice %11 {offsets = [0, 256], sizes = [8, 256], strides = [1, 1]} : vector<8x768xf32> to vector<8x256xf32>
    %27 = vector.extract_strided_slice %26 {offsets = [0, 0], sizes = [8, 128], strides = [1, 1]} : vector<8x256xf32> to vector<8x128xf32>
    %28 = vector.shape_cast %27 : vector<8x128xf32> to vector<1x8x128xf32>
    %29 = vector.extract_strided_slice %26 {offsets = [0, 128], sizes = [8, 128], strides = [1, 1]} : vector<8x256xf32> to vector<8x128xf32>
    %30 = vector.shape_cast %29 : vector<8x128xf32> to vector<1x8x128xf32>
    %31 = tpu.concatenate %28, %30 in 0 : vector<1x8x128xf32>, vector<1x8x128xf32> -> vector<2x8x128xf32>
    %32 = vector.extract_strided_slice %11 {offsets = [0, 512], sizes = [8, 256], strides = [1, 1]} : vector<8x768xf32> to vector<8x256xf32>
    %33 = vector.extract_strided_slice %32 {offsets = [0, 0], sizes = [8, 128], strides = [1, 1]} : vector<8x256xf32> to vector<8x128xf32>
    %34 = vector.shape_cast %33 : vector<8x128xf32> to vector<1x8x128xf32>
    %35 = vector.extract_strided_slice %32 {offsets = [0, 128], sizes = [8, 128], strides = [1, 1]} : vector<8x256xf32> to vector<8x128xf32>
    %36 = vector.shape_cast %35 : vector<8x128xf32> to vector<1x8x128xf32>
    %37 = tpu.concatenate %34, %36 in 0 : vector<1x8x128xf32>, vector<1x8x128xf32> -> vector<2x8x128xf32>
    "tpu.trace_start"() <{level = 10 : i32, message = "bqd,bkd->bqk"}> : () -> ()
    %cst_13 = arith.constant dense<0.000000e+00> : vector<2x8x8xf32>
    %38 = tpu.matmul %25, %31, %cst_13 {dimension_numbers = #tpu.dot_dimension_numbers<[2], [2], [1], [1], [0, 0, 0, 1, 1, 1], [0], [0]>} : vector<2x8x128xf32>, vector<2x8x128xf32>, vector<2x8x8xf32> -> vector<2x8x8xf32>
    "tpu.trace_stop"() : () -> ()
    %39 = vector.broadcast %19 : vector<2x1x8xf32> to vector<2x8x8xf32>
    %40 = arith.addf %38, %39 : vector<2x8x8xf32>
    %cst_14 = arith.constant dense<0xFF800000> : vector<2x8xf32>
    %41 = vector.multi_reduction <maximumf>, %40, %cst_14 [2] : vector<2x8x8xf32> to vector<2x8xf32>
    %42 = vector.shape_cast %41 : vector<2x8xf32> to vector<2x8x1xf32>
    %43 = vector.broadcast %42 : vector<2x8x1xf32> to vector<2x8x8xf32>
    %44 = arith.subf %40, %43 : vector<2x8x8xf32>
    %45 = math.exp %44 : vector<2x8x8xf32>
    %cst_15 = arith.constant dense<0.000000e+00> : vector<2x8xf32>
    %46 = vector.multi_reduction <add>, %45, %cst_15 [2] : vector<2x8x8xf32> to vector<2x8xf32>
    %47 = vector.shape_cast %46 : vector<2x8xf32> to vector<2x8x1xf32>
    %48 = tpu.reciprocal %47 {approx = true} : vector<2x8x1xf32> -> vector<2x8x1xf32>
    %49 = vector.broadcast %48 : vector<2x8x1xf32> to vector<2x8x8xf32>
    %50 = arith.mulf %45, %49 : vector<2x8x8xf32>
    "tpu.trace_start"() <{level = 10 : i32, message = "bqk,bkd->bqd"}> : () -> ()
    %cst_16 = arith.constant dense<0.000000e+00> : vector<2x8x128xf32>
    %51 = tpu.matmul %50, %37, %cst_16 {dimension_numbers = #tpu.dot_dimension_numbers<[2], [1], [1], [2], [0, 0, 0, 1, 1, 2], [0], [0]>} : vector<2x8x8xf32>, vector<2x8x128xf32>, vector<2x8x128xf32> -> vector<2x8x128xf32>
    "tpu.trace_stop"() : () -> ()
    %52 = vector.extract_strided_slice %51 {offsets = [0, 0, 0], sizes = [1, 8, 128], strides = [1, 1, 1]} : vector<2x8x128xf32> to vector<1x8x128xf32>
    %53 = vector.shape_cast %52 : vector<1x8x128xf32> to vector<8x128xf32>
    %54 = vector.extract_strided_slice %51 {offsets = [1, 0, 0], sizes = [1, 8, 128], strides = [1, 1, 1]} : vector<2x8x128xf32> to vector<1x8x128xf32>
    %55 = vector.shape_cast %54 : vector<1x8x128xf32> to vector<8x128xf32>
    %56 = tpu.concatenate %53, %55 in 1 : vector<8x128xf32>, vector<8x128xf32> -> vector<8x256xf32>
    %57 = arith.truncf %56 : vector<8x256xf32> to vector<8x256xbf16>
    %c0_17 = arith.constant 0 : index
    %c0_18 = arith.constant 0 : index
    %c0_19 = arith.constant 0 : index
    %58 = vector.load %arg6[%c0_17, %c0_18, %c0_19] : memref<1x256x128xbf16, #tpu.memory_space<vmem>>, vector<1x256x128xbf16>
    %59 = vector.shape_cast %58 : vector<1x256x128xbf16> to vector<256x128xbf16>
    %cst_20 = arith.constant dense<0.000000e+00> : vector<8x128xf32>
    %60 = tpu.matmul %57, %59, %cst_20 {dimension_numbers = #tpu.dot_dimension_numbers<[1], [0], [0], [1], [0, 0, 1, 1], [], []>} : vector<8x256xbf16>, vector<256x128xbf16>, vector<8x128xf32> -> vector<8x128xf32>
    %c0_21 = arith.constant 0 : index
    %c0_22 = arith.constant 0 : index
    %c0_23 = arith.constant 0 : index
    %61 = vector.load %arg7[%c0_21, %c0_22, %c0_23] : memref<1x1x128xf32, #tpu.memory_space<vmem>>, vector<1x1x128xf32>
    %62 = vector.shape_cast %61 : vector<1x1x128xf32> to vector<1x128xf32>
    %63 = vector.broadcast %62 : vector<1x128xf32> to vector<8x128xf32>
    %64 = arith.addf %60, %63 : vector<8x128xf32>
    %65 = arith.addf %64, %3 : vector<8x128xf32>
    %c0_24 = arith.constant 0 : index
    %c0_25 = arith.constant 0 : index
    %c0_26 = arith.constant 0 : index
    %66 = vector.load %arg8[%c0_24, %c0_25, %c0_26] : memref<1x1x128xf32, #tpu.memory_space<vmem>>, vector<1x1x128xf32>
    %67 = vector.shape_cast %66 : vector<1x1x128xf32> to vector<1x128xf32>
    %c0_27 = arith.constant 0 : index
    %c0_28 = arith.constant 0 : index
    %c0_29 = arith.constant 0 : index
    %68 = vector.load %arg9[%c0_27, %c0_28, %c0_29] : memref<1x1x128xf32, #tpu.memory_space<vmem>>, vector<1x1x128xf32>
    %69 = vector.shape_cast %68 : vector<1x1x128xf32> to vector<1x128xf32>
    %cst_30 = arith.constant dense<0.000000e+00> : vector<8xf32>
    %70 = vector.multi_reduction <add>, %65, %cst_30 [1] : vector<8x128xf32> to vector<8xf32>
    %71 = vector.shape_cast %70 : vector<8xf32> to vector<8x1xf32>
    %cst_31 = arith.constant 3.125000e-02 : f32
    %72 = vector.broadcast %cst_31 : f32 to vector<8x1xf32>
    %73 = arith.mulf %71, %72 : vector<8x1xf32>
    %74 = arith.mulf %65, %65 : vector<8x128xf32>
    %cst_32 = arith.constant dense<0.000000e+00> : vector<8xf32>
    %75 = vector.multi_reduction <add>, %74, %cst_32 [1] : vector<8x128xf32> to vector<8xf32>
    %76 = vector.shape_cast %75 : vector<8xf32> to vector<8x1xf32>
    %cst_33 = arith.constant 3.125000e-02 : f32
    %77 = vector.broadcast %cst_33 : f32 to vector<8x1xf32>
    %78 = arith.mulf %76, %77 : vector<8x1xf32>
    %79 = arith.mulf %73, %73 : vector<8x1xf32>
    %80 = arith.subf %78, %79 : vector<8x1xf32>
    %81 = vector.broadcast %73 : vector<8x1xf32> to vector<8x128xf32>
    %82 = arith.subf %65, %81 : vector<8x128xf32>
    %cst_34 = arith.constant 9.99999996E-13 : f32
    %83 = vector.broadcast %cst_34 : f32 to vector<8x1xf32>
    %84 = arith.addf %80, %83 : vector<8x1xf32>
    %85 = math.rsqrt %84 : vector<8x1xf32>
    %86 = vector.broadcast %85 : vector<8x1xf32> to vector<8x128xf32>
    %87 = arith.mulf %82, %86 : vector<8x128xf32>
    %88 = vector.broadcast %67 : vector<1x128xf32> to vector<8x128xf32>
    %89 = arith.mulf %87, %88 : vector<8x128xf32>
    %90 = vector.broadcast %69 : vector<1x128xf32> to vector<8x128xf32>
    %91 = arith.addf %89, %90 : vector<8x128xf32>
    %92 = arith.truncf %91 : vector<8x128xf32> to vector<8x128xbf16>
    %c0_35 = arith.constant 0 : index
    %c0_36 = arith.constant 0 : index
    %c0_37 = arith.constant 0 : index
    %93 = vector.load %arg10[%c0_35, %c0_36, %c0_37] : memref<1x128x128xbf16, #tpu.memory_space<vmem>>, vector<1x128x128xbf16>
    %94 = vector.shape_cast %93 : vector<1x128x128xbf16> to vector<128x128xbf16>
    %cst_38 = arith.constant dense<0.000000e+00> : vector<8x128xf32>
    %95 = tpu.matmul %92, %94, %cst_38 {dimension_numbers = #tpu.dot_dimension_numbers<[1], [0], [0], [1], [0, 0, 1, 1], [], []>} : vector<8x128xbf16>, vector<128x128xbf16>, vector<8x128xf32> -> vector<8x128xf32>
    %c0_39 = arith.constant 0 : index
    %c0_40 = arith.constant 0 : index
    %c0_41 = arith.constant 0 : index
    %96 = vector.load %arg11[%c0_39, %c0_40, %c0_41] : memref<1x1x128xf32, #tpu.memory_space<vmem>>, vector<1x1x128xf32>
    %97 = vector.shape_cast %96 : vector<1x1x128xf32> to vector<1x128xf32>
    %98 = vector.broadcast %97 : vector<1x128xf32> to vector<8x128xf32>
    %99 = arith.addf %95, %98 : vector<8x128xf32>
    %cst_42 = arith.constant 5.000000e-01 : f32
    %100 = vector.broadcast %cst_42 : f32 to vector<8x128xf32>
    %101 = arith.mulf %100, %99 : vector<8x128xf32>
    %cst_43 = arith.constant 4.471500e-02 : f32
    %102 = vector.broadcast %cst_43 : f32 to vector<8x128xf32>
    %103 = arith.mulf %102, %99 : vector<8x128xf32>
    %104 = arith.mulf %103, %99 : vector<8x128xf32>
    %105 = arith.mulf %104, %99 : vector<8x128xf32>
    %106 = arith.addf %99, %105 : vector<8x128xf32>
    %cst_44 = arith.constant 0.797884583 : f32
    %107 = vector.broadcast %cst_44 : f32 to vector<8x128xf32>
    %108 = arith.mulf %107, %106 : vector<8x128xf32>
    %109 = math.tanh %108 : vector<8x128xf32>
    %cst_45 = arith.constant 1.000000e+00 : f32
    %110 = vector.broadcast %cst_45 : f32 to vector<8x128xf32>
    %111 = arith.addf %110, %109 : vector<8x128xf32>
    %112 = arith.mulf %101, %111 : vector<8x128xf32>
    %113 = arith.truncf %112 : vector<8x128xf32> to vector<8x128xbf16>
    %c0_46 = arith.constant 0 : index
    %c0_47 = arith.constant 0 : index
    %c0_48 = arith.constant 0 : index
    %114 = vector.load %arg12[%c0_46, %c0_47, %c0_48] : memref<1x128x128xbf16, #tpu.memory_space<vmem>>, vector<1x128x128xbf16>
    %115 = vector.shape_cast %114 : vector<1x128x128xbf16> to vector<128x128xbf16>
    %cst_49 = arith.constant dense<0.000000e+00> : vector<8x128xf32>
    %116 = tpu.matmul %113, %115, %cst_49 {dimension_numbers = #tpu.dot_dimension_numbers<[1], [0], [0], [1], [0, 0, 1, 1], [], []>} : vector<8x128xbf16>, vector<128x128xbf16>, vector<8x128xf32> -> vector<8x128xf32>
    %c0_50 = arith.constant 0 : index
    %c0_51 = arith.constant 0 : index
    %c0_52 = arith.constant 0 : index
    %117 = vector.load %arg13[%c0_50, %c0_51, %c0_52] : memref<1x1x128xf32, #tpu.memory_space<vmem>>, vector<1x1x128xf32>
    %118 = vector.shape_cast %117 : vector<1x1x128xf32> to vector<1x128xf32>
    %119 = vector.broadcast %118 : vector<1x128xf32> to vector<8x128xf32>
    %120 = arith.addf %116, %119 : vector<8x128xf32>
    %121 = arith.addf %120, %91 : vector<8x128xf32>
    %c0_53 = arith.constant 0 : index
    %c0_54 = arith.constant 0 : index
    %c0_55 = arith.constant 0 : index
    %122 = vector.load %arg14[%c0_53, %c0_54, %c0_55] : memref<1x1x128xf32, #tpu.memory_space<vmem>>, vector<1x1x128xf32>
    %123 = vector.shape_cast %122 : vector<1x1x128xf32> to vector<1x128xf32>
    %c0_56 = arith.constant 0 : index
    %c0_57 = arith.constant 0 : index
    %c0_58 = arith.constant 0 : index
    %124 = vector.load %arg15[%c0_56, %c0_57, %c0_58] : memref<1x1x128xf32, #tpu.memory_space<vmem>>, vector<1x1x128xf32>
    %125 = vector.shape_cast %124 : vector<1x1x128xf32> to vector<1x128xf32>
    %cst_59 = arith.constant dense<0.000000e+00> : vector<8xf32>
    %126 = vector.multi_reduction <add>, %121, %cst_59 [1] : vector<8x128xf32> to vector<8xf32>
    %127 = vector.shape_cast %126 : vector<8xf32> to vector<8x1xf32>
    %cst_60 = arith.constant 3.125000e-02 : f32
    %128 = vector.broadcast %cst_60 : f32 to vector<8x1xf32>
    %129 = arith.mulf %127, %128 : vector<8x1xf32>
    %130 = arith.mulf %121, %121 : vector<8x128xf32>
    %cst_61 = arith.constant dense<0.000000e+00> : vector<8xf32>
    %131 = vector.multi_reduction <add>, %130, %cst_61 [1] : vector<8x128xf32> to vector<8xf32>
    %132 = vector.shape_cast %131 : vector<8xf32> to vector<8x1xf32>
    %cst_62 = arith.constant 3.125000e-02 : f32
    %133 = vector.broadcast %cst_62 : f32 to vector<8x1xf32>
    %134 = arith.mulf %132, %133 : vector<8x1xf32>
    %135 = arith.mulf %129, %129 : vector<8x1xf32>
    %136 = arith.subf %134, %135 : vector<8x1xf32>
    %137 = vector.broadcast %129 : vector<8x1xf32> to vector<8x128xf32>
    %138 = arith.subf %121, %137 : vector<8x128xf32>
    %cst_63 = arith.constant 9.99999996E-13 : f32
    %139 = vector.broadcast %cst_63 : f32 to vector<8x1xf32>
    %140 = arith.addf %136, %139 : vector<8x1xf32>
    %141 = math.rsqrt %140 : vector<8x1xf32>
    %142 = vector.broadcast %141 : vector<8x1xf32> to vector<8x128xf32>
    %143 = arith.mulf %138, %142 : vector<8x128xf32>
    %144 = vector.broadcast %123 : vector<1x128xf32> to vector<8x128xf32>
    %145 = arith.mulf %143, %144 : vector<8x128xf32>
    %146 = vector.broadcast %125 : vector<1x128xf32> to vector<8x128xf32>
    %147 = arith.addf %145, %146 : vector<8x128xf32>
    %c0_64 = arith.constant 0 : index
    %c0_65 = arith.constant 0 : index
    %148 = vector.load %arg21[%c0_64, %c0_65] : memref<8x128xf32, #tpu.memory_space<vmem>>, vector<8x128xf32>
    tpu.vector_store %arg21[%c0_64, %c0_65], %147 {strides = array<i32>} : memref<8x128xf32, #tpu.memory_space<vmem>>, vector<8x128xf32>,
    %c1_i32 = arith.constant 1 : i32
    %149 = arith.cmpi eq, %arg1, %c1_i32 : i32
    %150 = arith.extui %149 : i1 to i32
    %c0_i32_66 = arith.constant 0 : i32
    %151 = arith.cmpi ne, %150, %c0_i32_66 : i32
    scf.if %151 {
      %c0_67 = arith.constant 0 : index
      %c0_68 = arith.constant 0 : index
      %152 = tpu.strided_load %arg21[%c0_67, %c0_68] {strides = array<i32: 8, 1>} : memref<8x128xf32, #tpu.memory_space<vmem>>, vector<1x128xf32>
      %c0_69 = arith.constant 0 : index
      %c0_70 = arith.constant 0 : index
      %153 = vector.load %arg16[%c0_69, %c0_70] : memref<128x128xf32, #tpu.memory_space<vmem>>, vector<128x128xf32>
      %cst_71 = arith.constant dense<0.000000e+00> : vector<1x128xf32>
      %154 = tpu.matmul %152, %153, %cst_71 {dimension_numbers = #tpu.dot_dimension_numbers<[1], [0], [0], [1], [0, 0, 1, 1], [], []>} : vector<1x128xf32>, vector<128x128xf32>, vector<1x128xf32> -> vector<1x128xf32>
      %c0_72 = arith.constant 0 : index
      %c0_73 = arith.constant 0 : index
      %155 = vector.load %arg17[%c0_72, %c0_73] : memref<1x128xf32, #tpu.memory_space<vmem>>, vector<1x128xf32>
      %156 = arith.addf %154, %155 : vector<1x128xf32>
      %157 = math.tanh %156 : vector<1x128xf32>
      %c0_74 = arith.constant 0 : index
      %c0_75 = arith.constant 0 : index
      %158 = vector.load %arg18[%c0_74, %c0_75] : memref<128x128xf32, #tpu.memory_space<vmem>>, vector<128x128xf32>
      %cst_76 = arith.constant dense<0.000000e+00> : vector<1x128xf32>
      %159 = tpu.matmul %157, %158, %cst_76 {dimension_numbers = #tpu.dot_dimension_numbers<[1], [0], [0], [1], [0, 0, 1, 1], [], []>} : vector<1x128xf32>, vector<128x128xf32>, vector<1x128xf32> -> vector<1x128xf32>
      %c0_77 = arith.constant 0 : index
      %c0_78 = arith.constant 0 : index
      %160 = vector.load %arg19[%c0_77, %c0_78] : memref<1x128xf32, #tpu.memory_space<vmem>>, vector<1x128xf32>
      %161 = arith.addf %159, %160 : vector<1x128xf32>
      %c0_79 = arith.constant 0 : index
      %c0_80 = arith.constant 0 : index
      %c0_81 = arith.constant 0 : index
      %162 = vector.load %arg20[%c0_79, %c0_80, %c0_81] : memref<1x1x128xf32, #tpu.memory_space<vmem>>, vector<1x1x128xf32>
      %163 = vector.shape_cast %162 : vector<1x1x128xf32> to vector<1x128xf32>
      %164 = vector.shape_cast %161 : vector<1x128xf32> to vector<1x1x128xf32>
      tpu.vector_store %arg20[%c0_79, %c0_80, %c0_81], %164 {strides = array<i32>} : memref<1x1x128xf32, #tpu.memory_space<vmem>>, vector<1x1x128xf32>,
    } else {
    }
    return
  }
  func.func @transform_1(%arg0: i32, %arg1: i32) -> (i32, i32, i32) {
    %c0_i32 = arith.constant 0 : i32
    %c0_i32_0 = arith.constant 0 : i32
    %c0_i32_1 = arith.constant 0 : i32
    return %arg0, %c0_i32, %c0_i32_0 : i32, i32, i32
  }
  func.func @transform_2(%arg0: i32, %arg1: i32) -> (i32, i32, i32) {
    %c0_i32 = arith.constant 0 : i32
    %c0_i32_0 = arith.constant 0 : i32
    %c0_i32_1 = arith.constant 0 : i32
    return %arg1, %c0_i32, %c0_i32_0 : i32, i32, i32
  }
  func.func @transform_3(%arg0: i32, %arg1: i32) -> (i32, i32, i32) {
    %c0_i32 = arith.constant 0 : i32
    %c0_i32_0 = arith.constant 0 : i32
    %c0_i32_1 = arith.constant 0 : i32
    return %arg1, %c0_i32, %c0_i32_0 : i32, i32, i32
  }
  func.func @transform_4(%arg0: i32, %arg1: i32) -> (i32, i32, i32) {
    %c0_i32 = arith.constant 0 : i32
    %c0_i32_0 = arith.constant 0 : i32
    %c0_i32_1 = arith.constant 0 : i32
    return %arg1, %c0_i32, %c0_i32_0 : i32, i32, i32
  }
  func.func @transform_5(%arg0: i32, %arg1: i32) -> (i32, i32, i32) {
    %c0_i32 = arith.constant 0 : i32
    %c0_i32_0 = arith.constant 0 : i32
    %c0_i32_1 = arith.constant 0 : i32
    return %arg1, %c0_i32, %c0_i32_0 : i32, i32, i32
  }
  func.func @transform_6(%arg0: i32, %arg1: i32) -> (i32, i32, i32) {
    %c0_i32 = arith.constant 0 : i32
    %c0_i32_0 = arith.constant 0 : i32
    %c0_i32_1 = arith.constant 0 : i32
    return %arg1, %c0_i32, %c0_i32_0 : i32, i32, i32
  }
  func.func @transform_7(%arg0: i32, %arg1: i32) -> (i32, i32, i32) {
    %c0_i32 = arith.constant 0 : i32
    %c0_i32_0 = arith.constant 0 : i32
    %c0_i32_1 = arith.constant 0 : i32
    return %arg1, %c0_i32, %c0_i32_0 : i32, i32, i32
  }
  func.func @transform_8(%arg0: i32, %arg1: i32) -> (i32, i32, i32) {
    %c0_i32 = arith.constant 0 : i32
    %c0_i32_0 = arith.constant 0 : i32
    %c0_i32_1 = arith.constant 0 : i32
    return %arg1, %c0_i32, %c0_i32_0 : i32, i32, i32
  }
  func.func @transform_9(%arg0: i32, %arg1: i32) -> (i32, i32, i32) {
    %c0_i32 = arith.constant 0 : i32
    %c0_i32_0 = arith.constant 0 : i32
    %c0_i32_1 = arith.constant 0 : i32
    return %arg1, %c0_i32, %c0_i32_0 : i32, i32, i32
  }
  func.func @transform_10(%arg0: i32, %arg1: i32) -> (i32, i32, i32) {
    %c0_i32 = arith.constant 0 : i32
    %c0_i32_0 = arith.constant 0 : i32
    %c0_i32_1 = arith.constant 0 : i32
    return %arg1, %c0_i32, %c0_i32_0 : i32, i32, i32
  }
  func.func @transform_11(%arg0: i32, %arg1: i32) -> (i32, i32, i32) {
    %c0_i32 = arith.constant 0 : i32
    %c0_i32_0 = arith.constant 0 : i32
    %c0_i32_1 = arith.constant 0 : i32
    return %arg1, %c0_i32, %c0_i32_0 : i32, i32, i32
  }
  func.func @transform_12(%arg0: i32, %arg1: i32) -> (i32, i32, i32) {
    %c0_i32 = arith.constant 0 : i32
    %c0_i32_0 = arith.constant 0 : i32
    %c0_i32_1 = arith.constant 0 : i32
    return %arg1, %c0_i32, %c0_i32_0 : i32, i32, i32
  }
  func.func @transform_13(%arg0: i32, %arg1: i32) -> (i32, i32, i32) {
    %c0_i32 = arith.constant 0 : i32
    %c0_i32_0 = arith.constant 0 : i32
    %c0_i32_1 = arith.constant 0 : i32
    return %arg1, %c0_i32, %c0_i32_0 : i32, i32, i32
  }
  func.func @transform_14(%arg0: i32, %arg1: i32) -> (i32, i32) {
    %c0_i32 = arith.constant 0 : i32
    %c0_i32_0 = arith.constant 0 : i32
    %c0_i32_1 = arith.constant 0 : i32
    return %c0_i32, %c0_i32_0 : i32, i32
  }
  func.func @transform_15(%arg0: i32, %arg1: i32) -> (i32, i32) {
    %c0_i32 = arith.constant 0 : i32
    %c0_i32_0 = arith.constant 0 : i32
    %c0_i32_1 = arith.constant 0 : i32
    return %c0_i32, %c0_i32_0 : i32, i32
  }
  func.func @transform_16(%arg0: i32, %arg1: i32) -> (i32, i32) {
    %c0_i32 = arith.constant 0 : i32
    %c0_i32_0 = arith.constant 0 : i32
    %c0_i32_1 = arith.constant 0 : i32
    return %c0_i32, %c0_i32_0 : i32, i32
  }
  func.func @transform_17(%arg0: i32, %arg1: i32) -> (i32, i32) {
    %c0_i32 = arith.constant 0 : i32
    %c0_i32_0 = arith.constant 0 : i32
    %c0_i32_1 = arith.constant 0 : i32
    return %c0_i32, %c0_i32_0 : i32, i32
  }
  func.func @transform_18(%arg0: i32, %arg1: i32) -> (i32, i32, i32) {
    %c0_i32 = arith.constant 0 : i32
    %c0_i32_0 = arith.constant 0 : i32
    %c0_i32_1 = arith.constant 0 : i32
    return %arg0, %c0_i32, %c0_i32_0 : i32, i32, i32
  }
}

</mosaic_0001>

<bundles_post_ra>
// kernel: _lambda_.1
= control target key start
LH: loop header
LB: loop body
LE: loop exit
PB: predicated region body
PF: predicated region fallthrough
CT: control target
= control target key end

     0   :  { %s3751_s0 = inlined_call_operand.vmem [shape: f32[2,8,128], index: 0, kind: input, shape index: {}]   ;;  %s3752_s1 = inlined_call_operand.vmem [shape: f32[2,1,8], index: 1, kind: input, shape index: {}]   ;;  %s3753_s2 = inlined_call_operand.hbm [shape: bf16[2,128,768], index: 2, kind: input, shape index: {}]   ;;  %s3754_s3 = inlined_call_operand.vmem [shape: f32[2,1,768], index: 3, kind: input, shape index: {}]   ;;  %s3755_s4 = inlined_call_operand.vmem [shape: bf16[2,256,128], index: 4, kind: input, shape index: {}]   ;;  %s3756_s5 = inlined_call_operand.vmem [shape: f32[2,1,128], index: 5, kind: input, shape index: {}]   ;;  %s3757_s6 = inlined_call_operand.vmem [shape: f32[2,1,128], index: 6, kind: input, shape index: {}]   ;;  %s3758_s7 = inlined_call_operand.vmem [shape: f32[2,1,128], index: 7, kind: input, shape index: {}]   ;;  %s3759_s8 = inlined_call_operand.vmem [shape: bf16[2,128,128], index: 8, kind: input, shape index: {}]   ;;  %s3760_s9 = inlined_call_operand.vmem [shape: f32[2,1,128], index: 9, kind: input, shape index: {}]   ;;  %s3761_s10 = inlined_call_operand.vmem [shape: bf16[2,128,128], index: 10, kind: input, shape index: {}]   ;;  %s3762_s11 = inlined_call_operand.vmem [shape: f32[2,1,128], index: 11, kind: input, shape index: {}]   ;;  %s3763_s12 = inlined_call_operand.vmem [shape: f32[2,1,128], index: 12, kind: input, shape index: {}]   ;;  %s3764_s13 = inlined_call_operand.vmem [shape: f32[2,1,128], index: 13, kind: input, shape index: {}]   ;;  %s3765_s14 = inlined_call_operand.hbm [shape: f32[128,128], index: 14, kind: input, shape index: {}]   ;;  %s3766_s15 = inlined_call_operand.vmem [shape: f32[1,128], index: 15, kind: input, shape index: {}]   ;;  %s3767_s16 = inlined_call_operand.hbm [shape: f32[128,128], index: 16, kind: input, shape index: {}]   ;;  %s3768_s17 = inlined_call_operand.vmem [shape: f32[1,128], index: 17, kind: input, shape index: {}]   ;;  %s3769_s18 = inlined_call_operand.vmem [shape: f32[2,1,128], index: 18, kind: output, shape index: {}]  }
   0x1   :  { %3778 = sst [smem:[#allocation21_spill]] %s3751_s0 }
   0x2   :  { %3779 = sst [smem:[#allocation22_spill]] %s3752_s1 }
   0x3   :  { %3780 = sst [smem:[#allocation23_spill]] %s3753_s2 }
   0x4   :  { %3781 = sst [smem:[#allocation24_spill]] %s3754_s3 }
   0x5   :  { %3782 = sst [smem:[#allocation25_spill]] %s3755_s4 }
   0x6   :  { %3783 = sst [smem:[#allocation26_spill]] %s3758_s7 }
   0x7   :  { %3784 = sst [smem:[#allocation27_spill]] %s3759_s8 }
   0x8   :  { %3785 = sst [smem:[#allocation28_spill]] %s3761_s10 }
   0x9   :  { %3786 = sst [smem:[#allocation29_spill]] %s3762_s11 }
   0xa   :  { %3787 = sst [smem:[#allocation30_spill]] %s3763_s12 }
   0xb   :  { %3788 = sst [smem:[#allocation31_spill]] %s3764_s13 }
   0xc   :  { %3789 = sst [smem:[#allocation32_spill]] %s3765_s14 }
   0xd   :  { %3790 = sst [smem:[#allocation33_spill]] %s3766_s15 }
   0xe   :  { %3791 = sst [smem:[#allocation34_spill]] %s3767_s16 }
   0xf   :  { %3792 = sst [smem:[#allocation35_spill]] %s3768_s17 }
  0x10   :  { %3793 = sst [smem:[#allocation36_spill]] %s3769_s18 }
  0x11   :  { %23 = vsyncpa [#allocation5], 0 }
  0x12   :  { %25 = vsyncpa [#allocation5 + $0x1], 0 }
  0x13   :  { %26 = vsyncpa [#allocation7], 0  ;;  %s3301_s27 = smov 0   ;;  %s3303_s28 = smov 0  }
  0x14   :  { %s3305_s29 = smov 0   ;;  %s3307_s30 = smov 0  }
  0x15   :  { %s3309_s0 = smov 0   ;;  %s3311_s19 = smov 0  }
  0x16   :  { %s3313_s1 = smov 0   ;;  %s3315_s20 = smov 0  }
  0x17 LB: > { %3794 = sst [smem:[#allocation13_spill]] %s3168_s28  ;;  %s2489_s21 = sadd.s32 4294967295, %s3192_s20   ;;  %s3192_s20 = sphi %s3315_s20, %s32_s20   ;;  %s3188_s1 = sphi %s3313_s1, %s3842_s1   ;;  %s3184_s19 = sphi %s3311_s19, %s3841_s19   ;;  %s3180_s0 = sphi %s3309_s0, %s3840_s0   ;;  %s3176_s30 = sphi %s3307_s30, %s3839_s30   ;;  %s3172_s29 = sphi %s3305_s29, %s3838_s29   ;;  %s3168_s28 = sphi %s3303_s28, %s3837_s28   ;;  %s3164_s27 = sphi %s3301_s27, %s3836_s27  }
  0x18   : > { %3795 = sst [smem:[#allocation14_spill]] %s3172_s29  ;;  %p90_p0 = scmp.ne.s32.totalorder %s3168_s28, %s3164_s27 }
  0x19   : > { %3796 = sst [smem:[#allocation15_spill]] %s3184_s19  ;;  %p3341_p1 = scmp.eq.s32.totalorder %s2489_s21, 0 }
  0x1a   : > { %3797 = sst [smem:[#allocation16_spill]] %s3188_s1  ;;  %p2491_p2 = scmp.ge.s32.totalorder %s3192_s20, 1 }
  0x1b   : > { %3798 = sst [smem:[#allocation17_spill]] %s3192_s20  ;;  %p497_p3 = scmp.lt.s32.totalorder %s3192_s20, 5 }
  0x1c   : > { %s3799_s22 = scalar_select %p3341_p1, 1, 0 }
  0x1d   : > { %p3349_p4 = por %p3341_p1, %p90_p0  ;;  %p3353_p5 = pnand %p2491_p2, %p497_p3 }
  0x1e   : > { %s3194_s24 = smov [#allocation6]   ;;  %s3195_s27 = smov [#allocation8]  }
  0x1f   : > { %s509_s25 = sshll.u32 %s3194_s24, 4  ;;  %p2829_p6 = pneg %p3353_p5  ;;  %s510_s25 = int_to_ptr.vmem [resolvable:$true] %s509_s25 }
  0x20   : > { %s525_s21 = sshll.u32 %s3195_s27, 4  ;;  %s3051_s17 = scalar_lea.vmem %s510_s25, 2048  ;;  %s526_s21 = int_to_ptr.vmem [resolvable:$true] %s525_s21 }
  0x21   : > { %p3361_p7 = pnand %p2829_p6, %p3341_p1  ;;  %p3052_p9 = scmp.ne.s32.totalorder %s510_s25, %s3051_s17 }
  0x22   : > { %p3059_p12 = scmp.lt.s32.totalorder %s510_s25, %s510_s25  ;;  %p3060_p13 = scmp.lt.s32.totalorder %s3051_s17, %s3051_s17 }
  0x23   : > { %p3042_p8 = pneg %p3361_p7 }
  0x24   : > { %p3061_p0 = por %p3060_p13, %p3059_p12 }
  0x25   : > { %p3054_p10 = pnand %p3052_p9, %p3042_p8 }
  0x27   : > { %p3055_p11 = pneg %p3054_p10 }
  0x29   : > { %p3062_p2 = pnand %p3061_p0, %p3055_p11 }
  0x2b   : > { %3065 = shalt.err (!%p3062_p2)
}
  0x2c   : > { %s3196_s24 = smov 128   ;;  %s3197_s15 = smov 8  }
  0x2d   : > { %s3803_s14 = sld [smem:[#allocation32_spill]]  ;;  %s3077_s12 = scalar_lea.vmem %s526_s21, 2048 }
  0x2e   : > { %p3078_p3 = scmp.ne.s32.totalorder %s526_s21, %s3077_s12  ;;  %p3085_p10 = scmp.lt.s32.totalorder %s526_s21, %s526_s21 }
  0x2f   : > { %p3086_p1 = scmp.lt.s32.totalorder %s3077_s12, %s3077_s12 }
  0x30   : > { %p3080_p6 = pnand %p3078_p3, %p3042_p8 }
  0x31   : > { %p3087_p12 = por %p3086_p1, %p3085_p10 }
  0x32   : > { %p3081_p9 = pneg %p3080_p6 }
  0x33   : > { %2832 = dma.hbm_to_vmem [thread:$0]  (!%p3361_p7), %s3803_s14, 2048, %s510_s25, [#allocation7], %s3196_s24, %s3196_s24, %s3197_s15  }
  0x34   : > { %p3088_p11 = pnand %p3087_p12, %p3081_p9 }
  0x36   : > { %3091 = shalt.err (!%p3088_p11)
}
  0x37   : > { %s3804_s16 = sld [smem:[#allocation34_spill]]  ;;  %s41_s12 = sadd.s32 1, %s3184_s19 }
  0x38   : > { %s44_s13 = sadd.s32 1, %s3188_s1  ;;  %p42_p1 = scmp.ge.s32.totalorder %s41_s12, 2 }
  0x39   : > { %s77_s25 = sadd.s32 1, %s3172_s29  ;;  %p84_p8 = scmp.ne.s32.totalorder %s3172_s29, %s3168_s28 }
  0x3a   : > { %p85_p13 = scmp.eq.s32.totalorder %s3192_s20, 0  ;;  %s3844_s12 = smov (%p42_p1, %s41_s12), 0 }
  0x3b   : > { %3805 = sst [smem:[#allocation18_spill]] %s3844_s12  ;;  %s3846_s13 = smov (!%p42_p1, %s44_s13), %s3188_s1 }
  0x3c   : > { %s74_s11 = ssub.s32 %s3184_s19, %s3844_s12  ;;  %p86_p0 = por %p85_p13, %p84_p8 }
  0x3d   : > { %2835 = dma.hbm_to_vmem [thread:$0]  (!%p3361_p7), %s3804_s16, 2048, %s526_s21, [#allocation7], %s3196_s24, %s3196_s24, %s3197_s15  }
  0x3e   : > { %p46_p2 = scmp.ge.s32.totalorder %s3846_s13, 2  ;;  %p75_p3 = scmp.eq.s32.totalorder %s74_s11, 0 }
  0x3f   : > { %p2842_p6 = scmp.lt.s32.totalorder %s3192_s20, 4  ;;  %s548_s26 = sand.u32 1, %s3172_s29  }
  0x40   : > { %s3848_s13 = smov (%p46_p2, %s3846_s13), 0  ;;  %s2815_s21 = smul.u32 384, %s548_s26 }
  0x41   : > { %3806 = sst [smem:[#allocation19_spill]] %s3848_s13  ;;  %s2816_s24 = smul.u32 6144, %s3184_s19 }
  0x42   : > { %s3399_s15 = scalar_select %p75_p3, %s3172_s29, %s77_s25  }
  0x43   : > { %p3402_p7 = pnand %p2842_p6, %p86_p0  ;;  %s3809_s16 = sld [smem:[#allocation23_spill]] }
  0x44   : > { %3807 = sst [smem:[#allocation20_spill]] %s3399_s15  ;;  %s552_s1 = scalar_lea.vmem [#allocation4], %s2815_s21 }
  0x45   : > { %s559_s10 = sshll.u32 %s552_s1, 4  ;;  %s549_s11 = scalar_lea.sflag [#allocation5], %s548_s26  ;;  %s560_s10 = int_to_ptr.vmem [resolvable:$true] %s559_s10 }
  0x46   : > { %p3094_p9 = pneg %p3402_p7  ;;  %s3105_s13 = scalar_lea.vmem %s560_s10, 6144 }
  0x47   : > { %p3106_p10 = scmp.ne.s32.totalorder %s560_s10, %s3105_s13  ;;  %s3198_s25 = smov [#allocation4]  }
  0x48   : > { %s3110_s19 = sshll.u32 %s3198_s25, 4  ;;  %s3111_s19 = int_to_ptr.vmem [resolvable:$false] %s3110_s19 }
  0x49   : > { %s558_s12 = scalar_lea.hbm %s3809_s16, %s2816_s24  ;;  %p3108_p12 = pnand %p3106_p10, %p3094_p9 }
  0x4a   : > { %s3112_s15 = scalar_lea.vmem %s3111_s19, 12288  ;;  %p3113_p1 = scmp.lt.s32.totalorder %s560_s10, %s3111_s19 }
  0x4b   : > { %p3109_p11 = pneg %p3108_p12  ;;  %p3114_p8 = scmp.lt.s32.totalorder %s3112_s15, %s3105_s13 }
  0x4d   : > { %p3115_p13 = por %p3114_p8, %p3113_p1 }
  0x4f   : > { %p3116_p0 = pnand %p3115_p13, %p3109_p11 }
  0x51   : > { %3119 = shalt.err (!%p3116_p0)
}
  0x52   : > { %s3199_s14 = smov 384   ;;  %s3200_s16 = smov 24  }
  0x53   : > { %2839 = dma.hbm_to_vmem [thread:$0]  (!%p3402_p7), %s558_s12, 6144, %s560_s10, %s549_s11, %s3199_s14, %s3199_s14, %s3200_s16  }
  0x54   : > { %644 = sbr.rel (%p3353_p5) target bundleno = 2455 (0x997), region = 88  ;;  %s646_s1 = sand.u32 (!%p3353_p5), 1, %s3168_s28  }
  0x55   : > { %s2817_s26 = smul.u32 (!%p3353_p5), 384, %s646_s1  ;;  %s647_s21 = scalar_lea.sflag (!%p3353_p5), [#allocation5], %s646_s1 }
  0x57   : > { %s3416_s24 = scalar_lea.vmem (!%p3353_p5), [#allocation4], %s2817_s26 }
  0x59   : > { %3153 = dma.done.wait (%p3349_p4), %s647_s21, 6144  }
  0x5a   : > { %3155 = vsyncadd (%p3349_p4), %s647_s21, 4294961152  ;;  %p3810_p2 = scmp.ne.s32.totalorder %s3799_s22, 0 }
  0x5c   : > { %3157 = dma.done.wait (%p3810_p2), [#allocation7], 4096  }
  0x5d   : > { %3159 = vsyncadd (%p3810_p2), [#allocation7], 4294963200  ;;  %p750_p5 = scmp.lt.s32.totalorder %s3180_s0, 1  ;;  %p753_p3 = scmp.lt.s32.totalorder %s3176_s30, 1 }
  0x5e   : > { %s3813_s4 = sld [smem:[#allocation25_spill]]  ;;  %p2505_p4 = scmp.ne.s32.totalorder %s3176_s30, 0 }
  0x5f   : > { %s3429_s10 = scalar_select %p750_p5, %s3180_s0, 1 }
  0x60   : > { %s3432_s19 = scalar_select %p753_p3, %s3176_s30, 1 }
  0x61   : > { %s3814_s3 = sld [smem:[#allocation24_spill]]  ;;  %s2506_s1 = sshll.u32 (!%p2505_p4), %s3180_s0, 3 }
  0x62   : > { %s2818_s17 = smul.u32 6, %s3432_s19  ;;  %s2600_s11 = sshll.u32 %s3432_s19, 7 }
  0x63   : > { %s2601_s25 = sshll.u32 %s3432_s19, 6  ;;  %s3816_s8 = sld [smem:[#allocation27_spill]] }
  0x64   : > { %s3447_s16 = scalar_lea.vmem %s3813_s4, %s2600_s11  ;;  %s778_s2 = scalar_lea.vmem %s3760_s9, %s3432_s19 }
  0x65   : > { %s3817_s21 = sld [smem:[#allocation28_spill]] }
  0x66   : > { %s3818_s13 = sld [smem:[#allocation29_spill]] }
  0x67   : > { %s3456_s29 = scalar_lea.vmem %s3814_s3, %s2818_s17  ;;  %s3819_s20 = sld [smem:[#allocation30_spill]] }
  0x69   : > { %s3470_s4 = scalar_lea.vmem %s3816_s8, %s2601_s25  ;;  %s3820_s8 = sld [smem:[#allocation31_spill]] }
  0x6b   : > { %s3479_s3 = scalar_lea.vmem %s3817_s21, %s2601_s25  ;;  %800 = sbr.rel (%p2505_p4) target bundleno = 120 (0x78), region = 104 }
  0x6c   : > { %s786_s27 = scalar_lea.vmem %s3818_s13, %s3432_s19  ;;  %s3821_s25 = sld [smem:[#allocation21_spill]] (!%p2505_p4) }
  0x6d   : > { %s789_s18 = scalar_lea.vmem %s3819_s20, %s3432_s19 }
  0x6f   : > { %s792_s7 = scalar_lea.vmem %s3820_s8, %s3432_s19 }
  0x72   : > { %s802_s17 = scalar_lea.vmem %s3821_s25, %s2506_s1 }
  0x73   : > { %v836_v0 = vld [vmem:[%s802_s17] sm:$0xff] }
  0x74   : > { %837 = vst [vmem:[#allocation2] sm:$0xff] %v836_v0 }
  0x75   : > { %845 = vsyncadd [#allocation3], 128 }
  0x76   : > { %3160 = dma.done.wait [#allocation3], 128 }
  0x77   : > { %3161 = vsyncadd [#allocation3], 4294967168 }
  0x78 PF: > { %v2920_v1 = vld [vmem:[%s3416_s24 + $0x15c] ss:$24 sps:$4 sm:$0xff]   ;;  %v2922_v2 = vld [vmem:[%s3416_s24 + $0x158] ss:$24 sps:$4 sm:$0xff]   ;;  %v3201_v3 = vmov 0   ;;  %v3202_v52 = vmov 0.0   ;;  %v901_v53 = vlaneseq }
  0x79   : > { %1244 = vmatprep.mubr.bf16.mxu1 %v3201_v3  ;;  %1203 = vmatprep.mubr.bf16.mxu0 %v3201_v3  ;;  %v2923_v4 = vld [vmem:[%s3416_s24 + $0x154] ss:$24 sps:$4 sm:$0xff]   ;;  %v2925_v5 = vld [vmem:[%s3416_s24 + $0x150] ss:$24 sps:$4 sm:$0xff]   ;;  %v2929_v8 = vld [vmem:[%s3416_s24 + $0x124] ss:$24 sps:$4 sm:$0xff]  }
  0x7a   : > { %1212 = vmatprep.subr.bf16.mxu1 %v2920_v1  ;;  %v2926_v6 = vld [vmem:[%s3416_s24 + $0x12c] ss:$24 sps:$4 sm:$0xff]   ;;  %v2928_v7 = vld [vmem:[%s3416_s24 + $0x128] ss:$24 sps:$4 sm:$0xff]   ;;  %1171 = vmatprep.subr.bf16.mxu0 %v2923_v4  ;;  %v2932_v10 = vld [vmem:[%s3416_s24 + $0xfc] ss:$24 sps:$4 sm:$0xff]  }
  0x7b   : > { %1213 = vmatpush1.bf16.msra.mxu1 %v2922_v2  ;;  %1172 = vmatpush1.bf16.msra.mxu0 %v2925_v5  ;;  %v2931_v9 = vld [vmem:[%s3416_s24 + $0x120] ss:$24 sps:$4 sm:$0xff]   ;;  %v2935_v12 = vld [vmem:[%s3416_s24 + $0xf4] ss:$24 sps:$4 sm:$0xff]   ;;  %v2937_v14 = vld [vmem:[%s3416_s24 + $0xf0] ss:$24 sps:$4 sm:$0xff]  }
  0x7c   : > { %1214 = vmatprep.subr.bf16.mxu1 %v2926_v6  ;;  %1173 = vmatprep.subr.bf16.mxu0 %v2929_v8  ;;  %v2934_v11 = vld [vmem:[%s3416_s24 + $0xf8] ss:$24 sps:$4 sm:$0xff]   ;;  %v2938_v13 = vld [vmem:[%s3416_s24 + $0xcc] ss:$24 sps:$4 sm:$0xff]   ;;  %v2940_v16 = vld [vmem:[%s3416_s24 + $0xc8] ss:$24 sps:$4 sm:$0xff]  }
  0x7d   : > { %v2941_v15 = vld [vmem:[%s3416_s24 + $0xc4] ss:$24 sps:$4 sm:$0xff]   ;;  %v2943_v18 = vld [vmem:[%s3416_s24 + $0xc0] ss:$24 sps:$4 sm:$0xff]   ;;  %v2947_v19 = vld [vmem:[%s3416_s24 + $0x94] ss:$24 sps:$4 sm:$0xff]  }
  0x7e   : > { %v2944_v17 = vld [vmem:[%s3416_s24 + $0x9c] ss:$24 sps:$4 sm:$0xff]   ;;  %v2946_v20 = vld [vmem:[%s3416_s24 + $0x98] ss:$24 sps:$4 sm:$0xff]   ;;  %v2950_v21 = vld [vmem:[%s3416_s24 + $0x6c] ss:$24 sps:$4 sm:$0xff]  }
  0x7f   : > { %1215 = vmatpush1.bf16.msra.mxu1 %v2928_v7  ;;  %1174 = vmatpush1.bf16.msra.mxu0 %v2931_v9  ;;  %v2949_v22 = vld [vmem:[%s3416_s24 + $0x90] ss:$24 sps:$4 sm:$0xff]   ;;  %v2953_v23 = vld [vmem:[%s3416_s24 + $0x64] ss:$24 sps:$4 sm:$0xff]   ;;  %v2955_v26 = vld [vmem:[%s3416_s24 + $0x60] ss:$24 sps:$4 sm:$0xff]  }
  0x80   : > { %1216 = vmatprep.subr.bf16.mxu1 %v2932_v10  ;;  %1175 = vmatprep.subr.bf16.mxu0 %v2935_v12  ;;  %v2952_v24 = vld [vmem:[%s3416_s24 + $0x68] ss:$24 sps:$4 sm:$0xff]   ;;  %v2956_v25 = vld [vmem:[%s3416_s24 + $0x3c] ss:$24 sps:$4 sm:$0xff]   ;;  %v2958_v28 = vld [vmem:[%s3416_s24 + $0x38] ss:$24 sps:$4 sm:$0xff]  }
  0x81   : > { %v2959_v27 = vld [vmem:[%s3416_s24 + $0x34] ss:$24 sps:$4 sm:$0xff]   ;;  %v2961_v30 = vld [vmem:[%s3416_s24 + $0x30] ss:$24 sps:$4 sm:$0xff]   ;;  %v2965_v32 = vld [vmem:[%s3416_s24 + $0x4] ss:$24 sps:$4 sm:$0xff]  }
  0x82   : > { %v2962_v29 = vld [vmem:[%s3416_s24 + $0xc] ss:$24 sps:$4 sm:$0xff]   ;;  %v2964_v31 = vld [vmem:[%s3416_s24 + $0x8] ss:$24 sps:$4 sm:$0xff]   ;;  %v3531_v33 = vld [vmem:[#allocation2] sm:$0xff]  ;;  %vm3203_vm0 = vmmov 0  }
  0x83   : > { %1217 = vmatpush1.bf16.msra.mxu1 %v2934_v11  ;;  %1176 = vmatpush1.bf16.msra.mxu0 %v2937_v14  ;;  %v2967_v34 = vld [vmem:[%s3416_s24] ss:$24 sps:$4 sm:$0xff]   ;;  %v850_v35 = vpack.c.bf16 %v3531_v33, %v3531_v33  ;;  %v2970_v36 = vld [vmem:[%s3416_s24 + $0x164] ss:$24 sps:$4 sm:$0xff]   ;;  %v2973_v38 = vld [vmem:[%s3416_s24 + $0x134] ss:$24 sps:$4 sm:$0xff]  }
  0x84   : > { %1218 = vmatprep.subr.bf16.mxu1 %v2938_v13  ;;  %1177 = vmatprep.subr.bf16.mxu0 %v2941_v15  ;;  %v2968_v37 = vld [vmem:[%s3416_s24 + $0x160] ss:$24 sps:$4 sm:$0xff]   ;;  %v2971_v39 = vld [vmem:[%s3416_s24 + $0x130] ss:$24 sps:$4 sm:$0xff]   ;;  %v2976_v40 = vld [vmem:[%s3416_s24 + $0x104] ss:$24 sps:$4 sm:$0xff]  }
  0x85   : > { %v2974_v41 = vld [vmem:[%s3416_s24 + $0x100] ss:$24 sps:$4 sm:$0xff]   ;;  %v2979_v42 = vld [vmem:[%s3416_s24 + $0xd4] ss:$24 sps:$4 sm:$0xff]   ;;  %v2977_v43 = vld [vmem:[%s3416_s24 + $0xd0] ss:$24 sps:$4 sm:$0xff]  }
  0x86   : > { %v2982_v44 = vld [vmem:[%s3416_s24 + $0xa4] ss:$24 sps:$4 sm:$0xff]   ;;  %v2980_v45 = vld [vmem:[%s3416_s24 + $0xa0] ss:$24 sps:$4 sm:$0xff]   ;;  %v2985_v46 = vld [vmem:[%s3416_s24 + $0x74] ss:$24 sps:$4 sm:$0xff]  }
  0x87   : > { %1219 = vmatpush1.bf16.msra.mxu1 %v2940_v16  ;;  %1178 = vmatpush1.bf16.msra.mxu0 %v2943_v18  ;;  %v2983_v47 = vld [vmem:[%s3416_s24 + $0x70] ss:$24 sps:$4 sm:$0xff]   ;;  %v2988_v48 = vld [vmem:[%s3416_s24 + $0x44] ss:$24 sps:$4 sm:$0xff]   ;;  %v2986_v49 = vld [vmem:[%s3416_s24 + $0x40] ss:$24 sps:$4 sm:$0xff]  }
  0x88   : > { %1220 = vmatprep.subr.bf16.mxu1 %v2944_v17  ;;  %1179 = vmatprep.subr.bf16.mxu0 %v2947_v19  ;;  %v2991_v50 = vld [vmem:[%s3416_s24 + $0x14] ss:$24 sps:$4 sm:$0xff]   ;;  %v2989_v51 = vld [vmem:[%s3416_s24 + $0x10] ss:$24 sps:$4 sm:$0xff]   ;;  %v3559_v54 = vshrl.u32 %v901_v53, 7  ;;  %vm1443_vm1 = vcmask 64512  }
  0x89   : > { %v3563_v56 = vld [vmem:[%s3456_s29] sm:$0x3f]  ;;  %s3822_s29 = sld [smem:[#allocation22_spill]]  ;;  %p2596_p6 = scmp.ne.s32.totalorder %s3176_s30, 1 }
  0x8a   : > { %v911_v55 = vsub.s32 2, %v3559_v54  ;;  %v903_v57 = vsub.s32 0, %v3559_v54  ;;  %v915_v59 = vsub.s32 3, %v3559_v54  ;;  %v907_v62 = vsub.s32 1, %v3559_v54  ;;  %s3826_s15 = sld [smem:[#allocation26_spill]] }
  0x8b   : > { %1221 = vmatpush1.bf16.msra.mxu1 %v2946_v20  ;;  %1180 = vmatpush1.bf16.msra.mxu0 %v2949_v22  ;;  %v919_v12 = vsub.s32 4, %v3559_v54  ;;  %s3831_s30 = sld [smem:[#allocation33_spill]] (!%p2596_p6) }
  0x8c   : > { %1222 = vmatprep.subr.bf16.mxu1 %v2950_v21  ;;  %1181 = vmatprep.subr.bf16.mxu0 %v2953_v23  ;;  %v912_v58 = vrot.slane %v3563_v56, %v911_v55  ;;  %v904_v60 = vrot.slane %v3563_v56, %v903_v57  ;;  %v916_v0 = vrot.slane %v3563_v56, %v915_v59  ;;  %v2995_v55 = vld [vmem:[%s3447_s16 + $0x30] sm:$0xff]   ;;  %v2999_v59 = vld [vmem:[%s3447_s16 + $0x20] sm:$0xff]  }
  0x8d   : > { %v908_v4 = vrot.slane %v3563_v56, %v907_v62  ;;  %v920_v13 = vrot.slane %v3563_v56, %v919_v12  ;;  %v3002_v62 = vld [vmem:[%s3447_s16 + $0x50] sm:$0xff]  }
  0x8f   : > { %1223 = vmatpush1.bf16.msra.mxu1 %v2952_v24  ;;  %1182 = vmatpush1.bf16.msra.mxu0 %v2955_v26  ;;  %s3823_s0 = scalar_lea.vmem %s3822_s29, %s3429_s10 }
  0x90   : > { %1224 = vmatprep.subr.bf16.mxu1 %v2956_v25  ;;  %1183 = vmatprep.subr.bf16.mxu0 %v2959_v27  ;;  %v1294_v19 = vld [vmem:[%s3823_s0] sm:$0x1]  ;;  %s3827_s11 = scalar_lea.vmem %s3826_s15, %s3432_s19  ;;  %s3832_s0 = sld [smem:[#allocation35_spill]] (!%p2596_p6) }
  0x91   : > { %v1295_v20 = vsub.f32 1.0, %v1294_v19 }
  0x93   : > { %1225 = vmatpush1.bf16.msra.mxu1 %v2958_v28  ;;  %1184 = vmatpush1.bf16.msra.mxu0 %v2961_v30  ;;  %v1296_v21 = vmul.f32 -1e+09, %v1295_v20  ;;  %v3009_v20 = vld [vmem:[%s3470_s4 + $0x30] sm:$0xff]  }
  0x94   : > { %1226 = vmatprep.subr.bf16.mxu1 %v2962_v29  ;;  %1185 = vmatprep.subr.bf16.mxu0 %v2965_v32 }
  0x95   : > { %v1301_v22 = vrot.slane %v1296_v21, %v903_v57  ;;  %v2997_v57 = vld [vmem:[%s3447_s16 + $0x28] sm:$0xff]  }
  0x96   : > { %v3010_v21 = vld [vmem:[%s3470_s4 + $0x28] sm:$0xff]  }
  0x97   : > { %1227 = vmatpush1.bf16.msra.mxu1 %v2964_v31  ;;  %1186 = vmatpush1.bf16.msra.mxu0 %v2967_v34 }
  0x98   : > { %1253 = vmatprep.subr.bf16.mxu0 %v2970_v36  ;;  %2695 = vmatprep.subr.mxu1 %v3202_v52 }
  0x9a   : > { %1245 = vmatmul.mubr.bf16.vlgmr.msra.gmra.mxu1 %v850_v35  ;;  %1204 = vmatmul.mubr.bf16.vlgmr.msra.gmra.mxu0 %v850_v35 }
  0x9b   : > { %1254 = vmatpush1.bf16.msra.mxu0 %v2968_v37  ;;  %1285 = vmatprep.mubr.bf16.mxu0 %v3201_v3 }
  0x9c   : > { %1255 = vmatprep.subr.bf16.mxu0 %v2973_v38  ;;  %2697 = vmatprep.mubr.msk.f32.mxu1 %vm3203_vm0, %v3202_v52 }
  0x9f   : > { %1256 = vmatpush1.bf16.msra.mxu0 %v2971_v39 }
  0xa0   : > { %1257 = vmatprep.subr.bf16.mxu0 %v2976_v40 }
  0xa3   : > { %1258 = vmatpush1.bf16.msra.mxu0 %v2974_v41 }
  0xa4   : > { %1259 = vmatprep.subr.bf16.mxu0 %v2979_v42 }
  0xa7   : > { %1260 = vmatpush1.bf16.msra.mxu0 %v2977_v43 }
  0xa8   : > { %1261 = vmatprep.subr.bf16.mxu0 %v2982_v44  ;;  %v923_v44 = vsub.s32 5, %v3559_v54  ;;  %v2994_v54 = vld [vmem:[%s3447_s16 + $0x70] sm:$0xff]  }
  0xab   : > { %1262 = vmatpush1.bf16.msra.mxu0 %v2980_v45  ;;  %v924_v45 = vrot.slane %v3563_v56, %v923_v44  ;;  %v2996_v56 = vld [vmem:[%s3447_s16 + $0x68] sm:$0xff]  }
  0xac   : > { %1263 = vmatprep.subr.bf16.mxu0 %v2985_v46  ;;  %v3018_v44 = vld [vmem:[%s3479_s3 + $0x28] sm:$0xff]  }
  0xaf   : > { %1264 = vmatpush1.bf16.msra.mxu0 %v2983_v47 }
  0xb0   : > { %1265 = vmatprep.subr.bf16.mxu0 %v2988_v48  ;;  %v2992_v48 = vld [vmem:[%s3447_s16 + $0x78] sm:$0xff]  }
  0xb3   : > { %1266 = vmatpush1.bf16.msra.mxu0 %v2986_v49 }
  0xb4   : > { %1267 = vmatprep.subr.bf16.mxu0 %v2991_v50 }
  0xb7   : > { %1268 = vmatpush1.bf16.msra.mxu0 %v2989_v51  ;;  %v2993_v51 = vld [vmem:[%s3447_s16 + $0x38] sm:$0xff]  }
  0xb8   : > { %2685 = vmatprep.subr.mxu0 %v3202_v52 }
  0xba   : > { %1286 = vmatmul.mubr.bf16.vlgmr.msra.gmra.mxu0 %v850_v35 }
  0xbb   : > { %2687 = vmatprep.mubr.msk.f32.mxu0 %vm3203_vm0, %v3202_v52 }
 0x15a   : > { %v1246_v61 = vpop.f32.mrf.mxu1  ;;  %v1205_v1 = vpop.f32.mrf.mxu0 }
 0x15b   : > { %v1247_v63 = vadd.f32 %v1246_v61, %v912_v58  ;;  %v1206_v3 = vadd.f32 %v1205_v1, %v904_v60  ;;  %v2998_v58 = vld [vmem:[%s3447_s16 + $0x60] sm:$0xff]   ;;  %v3000_v60 = vld [vmem:[%s3447_s16 + $0x58] sm:$0xff]   ;;  %v3005_v1 = vld [vmem:[%s3447_s16 + $0x8] sm:$0xff]  }
 0x15c   : > { %v1248_v2 = vpop.f32.mrf.mxu1  ;;  %v1207_v5 = vpop.f32.mrf.mxu0  ;;  %v3001_v61 = vld [vmem:[%s3447_s16 + $0x18] sm:$0xff]  }
 0x15d   : > { %2686 = vmatpush3.xpose.msra.mxu0 %v1247_v63  ;;  %v1249_v7 = vadd.f32 %v1248_v2, %v916_v0  ;;  %v1208_v10 = vadd.f32 %v1207_v5, %v908_v4  ;;  %v3003_v63 = vld [vmem:[%s3447_s16 + $0x10] sm:$0xff]   ;;  %v3004_v0 = vld [vmem:[%s3447_s16 + $0x48] sm:$0xff]   ;;  %v3006_v2 = vld [vmem:[%s3447_s16 + $0x40] sm:$0xff]  }
 0x15e   : > { %v1250_v6 = vpop.f32.mrf.mxu1  ;;  %2690 = vmatprep.subr.mxu0 %v3202_v52  ;;  %v1209_v8 = vpop.f32.mrf.mxu0 }
 0x160   : > { %v1251_v9 = vpop.f32.mrf.mxu1  ;;  %2688 = vmatmul.mubr.f32.vlgmr.msra.gmra.mxu0 %v1206_v3  ;;  %v1210_v11 = vpop.f32.mrf.mxu0  ;;  %v3007_v3 = vld [vmem:[%s3447_s16] sm:$0xff]   ;;  %s3824_s16 = scalar_lea.vmem %s3756_s5, %s3432_s19 }
 0x161   : > { %2691 = vmatpush3.xpose.msra.mxu0 %v1249_v7  ;;  %2692 = vmatprep.mubr.msk.f32.mxu0 %vm3203_vm0, %v3202_v52  ;;  %v2557_v12 = vld [vmem:[%s3824_s16] ss:$0 sm:$0xff]  ;;  %s3833_s16 = sld [smem:[#allocation36_spill]] (!%p2596_p6) }
 0x162   : > { %2705 = vmatprep.subr.bf16.mxu0 %v3202_v52 }
 0x164   : > { %2693 = vmatmul.mubr.f32.vlgmr.msra.gmra.mxu0 %v1208_v10  ;;  %v3008_v10 = vld [vmem:[%s3470_s4 + $0x38] sm:$0xff]  }
 0x165   : > { %2721 = vmatprep.mubr.msk.bf16.mxu0 %vm3203_vm0, %v3202_v52  ;;  %2706 = vmatpush3.bf16.msra.mxu0 %v3008_v10 }
 0x166   : > { %2707 = vmatprep.subr.bf16.mxu0 %v3202_v52 }
 0x167   : > { %s3834_s13 = scalar_lea.vmem (!%p2596_p6), %s3833_s16, %s3429_s10 }
 0x169   : > { %2708 = vmatpush3.bf16.msra.mxu0 %v3009_v20 }
 0x16a   : > { %2709 = vmatprep.subr.bf16.mxu0 %v3202_v52 }
 0x16d   : > { %2710 = vmatpush3.bf16.msra.mxu0 %v3010_v21  ;;  %v2595_v21 = vld [vmem:[%s792_s7] ss:$0 sm:$0xff] }
 0x16e   : > { %2711 = vmatprep.subr.bf16.mxu0 %v3202_v52 }
 0x17a   : > { %v1287_v14 = vpop.f32.mrf.mxu0 }
 0x17b   : > { %v1288_v15 = vadd.f32 %v1287_v14, %v920_v13 }
 0x17c   : > { %v1289_v16 = vpop.f32.mrf.mxu0 }
 0x17d   : > { %2696 = vmatpush3.msra.mxu1 %v1288_v15  ;;  %v1290_v49 = vadd.f32 %v1289_v16, %v924_v45  ;;  %v3019_v45 = vld [vmem:[%s3479_s3 + $0x20] sm:$0xff]  }
 0x17e   : > { %v1291_v17 = vpop.f32.mrf.mxu0  ;;  %2700 = vmatprep.subr.mxu1 %v3202_v52 }
 0x180   : > { %v1292_v18 = vpop.f32.mrf.mxu0 }
 0x220   : > { %v1369_v23 = vpop.f32.mrf.mxu0 }
 0x221   : > { %v1370_v24 = vadd.f32 %v1369_v23, %v1301_v22  ;;  %v3012_v23 = vld [vmem:[%s3470_s4 + $0x18] sm:$0xff]  }
 0x222   : > { %v2689_v25 = vpop.f32.mrf.mxu0 }
 0x223   : > { %v1444_v26 = vsel %vm1443_vm1, %v1370_v24, -inf  ;;  %v3015_v25 = vld [vmem:[%s3470_s4] sm:$0xff]  }
 0x224   : > { %1445 = vmax.xlane.f32.xlu0 %v1444_v26  ;;  %v1439_v27 = vpop.f32.mrf.mxu0 }
 0x225   : > { %v1440_v28 = vadd.f32 %v1439_v27, %v1301_v22  ;;  %v3011_v22 = vld [vmem:[%s3470_s4 + $0x20] sm:$0xff]  }
 0x226   : > { %v2694_v29 = vpop.f32.mrf.mxu0  ;;  %2712 = vmatpush3.bf16.msra.mxu0 %v3011_v22 }
 0x227   : > { %v1447_v30 = vsel %vm1443_vm1, %v1440_v28, -inf  ;;  %2713 = vmatprep.subr.bf16.mxu0 %v3202_v52 }
 0x228   : > { %1448 = vmax.xlane.f32.xlu0 %v1447_v30 }
 0x22a   : > { %2714 = vmatpush3.bf16.msra.mxu0 %v3012_v23 }
 0x22b   : > { %2715 = vmatprep.subr.bf16.mxu0 %v3202_v52 }
 0x2ad   : > { %v1446_v31 = vpop.xlane.xlu0 %1445 }
 0x2ae   : > { %v1450_v32 = vsub.f32 %v1370_v24, %v1446_v31  ;;  %v3014_v24 = vld [vmem:[%s3470_s4 + $0x8] sm:$0xff]  }
 0x2b0   : > { %v1452_v34 = vmul.f32 1.442695, %v1450_v32 }
 0x2b1   : > { %v1449_v35 = vpop.xlane.xlu0 %1448 }
 0x2b2   : > { %3024 = vpow2.f32 %v1452_v34  ;;  %v1451_v36 = vsub.f32 %v1440_v28, %v1449_v35 }
 0x2b4   : > { %v1454_v37 = vmul.f32 1.442695, %v1451_v36 }
 0x2b6   : > { %3026 = vpow2.f32 %v1454_v37 }
 0x2bf   : > { %v3025_v38 = vpop.eup %3024 }
 0x2c0   : > { %v1456_v39 = vsel %vm1443_vm1, %v3025_v38, 0.0 }
 0x2c1   : > { %1457 = vadd.xlane.f32.xlu1 %v1456_v39 }
 0x2c3   : > { %v3027_v40 = vpop.eup %3026 }
 0x2c4   : > { %v1459_v41 = vsel %vm1443_vm1, %v3027_v40, 0.0 }
 0x2c5   : > { %1460 = vadd.xlane.f32.xlu1 %v1459_v41 }
 0x34a   : > { %v1458_v42 = vpop.xlane.xlu1 %1457 }
 0x34b   : > { %3028 = vrcp.f32 %v1458_v42  ;;  %v3016_v42 = vld [vmem:[%s3479_s3 + $0x38] sm:$0xff]  }
 0x34e   : > { %v1461_v43 = vpop.xlane.xlu1 %1460 }
 0x34f   : > { %3030 = vrcp.f32 %v1461_v43  ;;  %v3017_v43 = vld [vmem:[%s3479_s3 + $0x30] sm:$0xff]  }
 0x358   : > { %v3029_v46 = vpop.eup %3028 }
 0x359   : > { %v1464_v47 = vmul.f32 %v3029_v46, %v3025_v38  ;;  %v2575_v38 = vld [vmem:[%s3827_s11] ss:$0 sm:$0xff]  ;;  %v3020_v46 = vld [vmem:[%s3479_s3 + $0x18] sm:$0xff]  }
 0x35b   : > { %2698 = vmatmul.mubr.msk.f32.vlgmr.msra.gmra.mxu1 %vm1443_vm1, %v1464_v47  ;;  %v3021_v47 = vld [vmem:[%s3479_s3 + $0x10] sm:$0xff]  }
 0x35c   : > { %v3031_v50 = vpop.eup %3030  ;;  %2701 = vmatpush3.msra.mxu1 %v1290_v49  ;;  %2702 = vmatprep.mubr.msk.f32.mxu1 %vm3203_vm0, %v3202_v52  ;;  %v3023_v49 = vld [vmem:[%s3479_s3] sm:$0xff]  }
 0x35d   : > { %v1465_v53 = vmul.f32 %v3031_v50, %v3027_v40  ;;  %2611 = vmatprep.subr.bf16.mxu1 %v2992_v48  ;;  %v3022_v48 = vld [vmem:[%s3479_s3 + $0x8] sm:$0xff]   ;;  %v2576_v50 = vld [vmem:[%s778_s2] ss:$0 sm:$0xff] }
 0x35f   : > { %2703 = vmatmul.mubr.msk.f32.vlgmr.msra.gmra.mxu1 %vm1443_vm1, %v1465_v53 }
 0x360   : > { %2612 = vmatpush3.bf16.msra.mxu1 %v2993_v51 }
 0x361   : > { %2613 = vmatprep.subr.bf16.mxu1 %v2994_v54 }
 0x364   : > { %2614 = vmatpush3.bf16.msra.mxu1 %v2995_v55 }
 0x365   : > { %2615 = vmatprep.subr.bf16.mxu1 %v2996_v56 }
 0x368   : > { %2616 = vmatpush3.bf16.msra.mxu1 %v2997_v57 }
 0x369   : > { %2617 = vmatprep.subr.bf16.mxu1 %v2998_v58 }
 0x36c   : > { %2618 = vmatpush3.bf16.msra.mxu1 %v2999_v59 }
 0x36d   : > { %2619 = vmatprep.subr.bf16.mxu1 %v3000_v60 }
 0x370   : > { %2620 = vmatpush3.bf16.msra.mxu1 %v3001_v61 }
 0x371   : > { %2621 = vmatprep.subr.bf16.mxu1 %v3002_v62 }
 0x374   : > { %2622 = vmatpush3.bf16.msra.mxu1 %v3003_v63 }
 0x375   : > { %2623 = vmatprep.subr.bf16.mxu1 %v3004_v0 }
 0x378   : > { %2624 = vmatpush3.bf16.msra.mxu1 %v3005_v1 }
 0x379   : > { %2625 = vmatprep.subr.bf16.mxu1 %v3006_v2  ;;  %v2585_v2 = vld [vmem:[%s786_s27] ss:$0 sm:$0xff] }
 0x37c   : > { %2626 = vmatpush3.bf16.msra.mxu1 %v3007_v3 }
 0x37d   : > { %2725 = vmatprep.subr.bf16.mxu1 %v3202_v52 }
 0x41b   : > { %v1535_v4 = vpop.f32.mrf.mxu1 }
 0x41c   : > { %v1612_v8 = vpack.c.bf16 %v1535_v4, %v1535_v4 }
 0x41d   : > { %v2699_v5 = vpop.f32.mrf.mxu1 }
 0x41f   : > { %v1608_v6 = vpop.f32.mrf.mxu1 }
 0x420   : > { %v1613_v7 = vpack.c.bf16 %v1608_v6, %v1608_v6 }
 0x421   : > { %v2704_v9 = vpop.f32.mrf.mxu1 }
 0x422   : > { %1781 = vmatprep.mubr.bf16.mxu1 %v1613_v7 }
 0x423   : > { %1782 = vmatmul.mubr.bf16.vlgmr.msra.gmra.mxu1 %v1612_v8 }
 0x424   : > { %2741 = vmatprep.mubr.msk.bf16.mxu1 %vm3203_vm0, %v3202_v52  ;;  %2726 = vmatpush3.bf16.msra.mxu1 %v3016_v42 }
 0x425   : > { %2727 = vmatprep.subr.bf16.mxu1 %v3202_v52 }
 0x428   : > { %2728 = vmatpush3.bf16.msra.mxu1 %v3017_v43 }
 0x429   : > { %2729 = vmatprep.subr.bf16.mxu1 %v3202_v52 }
 0x42c   : > { %2730 = vmatpush3.bf16.msra.mxu1 %v3018_v44 }
 0x42d   : > { %2731 = vmatprep.subr.bf16.mxu1 %v3202_v52 }
 0x430   : > { %2732 = vmatpush3.bf16.msra.mxu1 %v3019_v45 }
 0x431   : > { %2733 = vmatprep.subr.bf16.mxu1 %v3202_v52 }
 0x434   : > { %2734 = vmatpush3.bf16.msra.mxu1 %v3020_v46 }
 0x435   : > { %2735 = vmatprep.subr.bf16.mxu1 %v3202_v52 }
 0x438   : > { %2736 = vmatpush3.bf16.msra.mxu1 %v3021_v47 }
 0x439   : > { %2737 = vmatprep.subr.bf16.mxu1 %v3202_v52 }
 0x43c   : > { %2738 = vmatpush3.bf16.msra.mxu1 %v3022_v48 }
 0x43d   : > { %2739 = vmatprep.subr.bf16.mxu1 %v3202_v52 }
 0x440   : > { %2740 = vmatpush3.bf16.msra.mxu1 %v3023_v49 }
 0x4e3   : > { %v2627_v11 = vpop.f32.mrf.mxu1 }
 0x4e5   : > { %v2628_v13 = vpop.f32.mrf.mxu1 }
 0x4e6   : > { %v2629_v14 = vadd.f32 %v2628_v13, %v2627_v11 }
 0x4e7   : > { %v2630_v15 = vpop.f32.mrf.mxu1 }
 0x4e8   : > { %v1784_v16 = vadd.f32 %v2629_v14, %v2557_v12 }
 0x4e9   : > { %v2631_v17 = vpop.f32.mrf.mxu1 }
 0x4ea   : > { %v1789_v18 = vadd.f32 %v1784_v16, %v3531_v33  ;;  %v3013_v33 = vld [vmem:[%s3470_s4 + $0x10] sm:$0xff]   ;;  %s3825_s4 = scalar_lea.vmem %s3757_s6, %s3432_s19 }
 0x4eb   : > { %2716 = vmatpush3.bf16.msra.mxu0 %v3013_v33  ;;  %v2574_v36 = vld [vmem:[%s3825_s4] ss:$0 sm:$0xff] }
 0x4ec   : > { %1792 = vadd.xlane.f32.xlu0 %v1789_v18  ;;  %v1795_v19 = vmul.f32 %v1789_v18, %v1789_v18  ;;  %2717 = vmatprep.subr.bf16.mxu0 %v3202_v52 }
 0x4ee   : > { %1796 = vadd.xlane.f32.xlu1 %v1795_v19  ;;  %v2594_v19 = vld [vmem:[%s789_s18] ss:$0 sm:$0xff] }
 0x4ef   : > { %2718 = vmatpush3.bf16.msra.mxu0 %v3014_v24 }
 0x4f0   : > { %2719 = vmatprep.subr.bf16.mxu0 %v3202_v52 }
 0x4f3   : > { %2720 = vmatpush3.bf16.msra.mxu0 %v3015_v25 }
 0x575   : > { %v1793_v26 = vpop.xlane.xlu0 %1792 }
 0x576   : > { %v1794_v27 = vmul.f32 0.03125, %v1793_v26 }
 0x577   : > { %v1797_v28 = vpop.xlane.xlu1 %1796 }
 0x578   : > { %v1799_v29 = vmul.f32 %v1794_v27, %v1794_v27  ;;  %v1798_v30 = vmul.f32 0.03125, %v1797_v28  ;;  %v1801_v34 = vsub.f32 %v1789_v18, %v1794_v27 }
 0x57a   : > { %v1800_v31 = vsub.f32 %v1798_v30, %v1799_v29 }
 0x57c   : > { %v1802_v32 = vadd.f32 1e-12, %v1800_v31 }
 0x57e   : > { %3032 = vrsqrt.f32 %v1802_v32 }
 0x58b   : > { %v3033_v35 = vpop.eup %3032 }
 0x58c   : > { %v1804_v37 = vmul.f32 %v3033_v35, %v1801_v34 }
 0x58e   : > { %v1811_v39 = vmul.f32 %v2574_v36, %v1804_v37 }
 0x590   : > { %v1818_v40 = vadd.f32 %v2575_v38, %v1811_v39 }
 0x592   : > { %v1819_v41 = vpack.c.bf16 %v1818_v40, %v1818_v40 }
 0x594   : > { %2722 = vmatmul.mubr.bf16.vlgmr.msra.gmra.mxu0 %v1819_v41 }
 0x654   : > { %v1925_v51 = vpop.f32.mrf.mxu0 }
 0x655   : > { %v1926_v53 = vadd.f32 %v2576_v50, %v1925_v51 }
 0x656   : > { %v2723_v54 = vpop.f32.mrf.mxu0 }
 0x657   : > { %v1932_v55 = vmul.f32 0.044715, %v1926_v53  ;;  %v1931_v52 = vmul.f32 0.5, %v1926_v53 }
 0x658   : > { %v1928_v56 = vpop.f32.mrf.mxu0 }
 0x659   : > { %v1933_v57 = vmul.f32 %v1932_v55, %v1926_v53 }
 0x65a   : > { %v2724_v58 = vpop.f32.mrf.mxu0 }
 0x65b   : > { %v1934_v59 = vmul.f32 %v1933_v57, %v1926_v53 }
 0x65d   : > { %v1935_v60 = vadd.f32 %v1934_v59, %v1926_v53 }
 0x65f   : > { %v1936_v61 = vmul.f32 0.7978846, %v1935_v60 }
 0x661   : > { %3034 = vtanh.f32 %v1936_v61 }
 0x66e   : > { %v3035_v62 = vpop.eup %3034 }
 0x66f   : > { %v1938_v63 = vadd.f32 1.0, %v3035_v62 }
 0x671   : > { %v1939_v0 = vmul.f32 %v1938_v63, %v1931_v52 }
 0x673   : > { %v1940_v1 = vpack.c.bf16 %v1939_v0, %v1939_v0 }
 0x675   : > { %2742 = vmatmul.mubr.bf16.vlgmr.msra.gmra.mxu1 %v1940_v1 }
 0x735   : > { %v2046_v3 = vpop.f32.mrf.mxu1 }
 0x736   : > { %v2047_v4 = vadd.f32 %v2585_v2, %v2046_v3 }
 0x737   : > { %v2743_v5 = vpop.f32.mrf.mxu1 }
 0x738   : > { %v2052_v6 = vadd.f32 %v2047_v4, %v1818_v40 }
 0x739   : > { %v2049_v7 = vpop.f32.mrf.mxu1 }
 0x73a   : > { %2055 = vadd.xlane.f32.xlu0 %v2052_v6  ;;  %v2058_v8 = vmul.f32 %v2052_v6, %v2052_v6 }
 0x73b   : > { %v2744_v9 = vpop.f32.mrf.mxu1 }
 0x73c   : > { %2059 = vadd.xlane.f32.xlu1 %v2058_v8 }
 0x7c3   : > { %v2056_v10 = vpop.xlane.xlu0 %2055 }
 0x7c4   : > { %v2057_v11 = vmul.f32 0.03125, %v2056_v10 }
 0x7c5   : > { %v2060_v12 = vpop.xlane.xlu1 %2059 }
 0x7c6   : > { %v2062_v13 = vmul.f32 %v2057_v11, %v2057_v11  ;;  %v2061_v14 = vmul.f32 0.03125, %v2060_v12  ;;  %v2064_v17 = vsub.f32 %v2052_v6, %v2057_v11 }
 0x7c8   : > { %v2063_v15 = vsub.f32 %v2061_v14, %v2062_v13 }
 0x7ca   : > { %v2065_v16 = vadd.f32 1e-12, %v2063_v15 }
 0x7cc   : > { %3036 = vrsqrt.f32 %v2065_v16 }
 0x7d9   : > { %v3037_v18 = vpop.eup %3036 }
 0x7da   : > { %v2067_v20 = vmul.f32 %v3037_v18, %v2064_v17 }
 0x7dc   : > { %v2074_v22 = vmul.f32 %v2594_v19, %v2067_v20  ;;  %2086 = sbr.rel (%p2596_p6) target bundleno = 2455 (0x997), region = 142 }
 0x7de   : > { %v2081_v23 = vadd.f32 %v2595_v21, %v2074_v22 }
 0x7e0   : > { %2082 = vst [vmem:[#allocation2] sm:$0xff] %v2081_v23 }
 0x7e1   : > { %v2103_v33 = vld [vmem:[#allocation6 + $0x78] sm:$0xff]  ;;  %v3204_v24 = vmov 0.0   ;;  %v2102_v25 = vld [vmem:[#allocation6 + $0x70] sm:$0xff]  ;;  %vm3205_vm2 = vmmov 0   ;;  %v2101_v26 = vld [vmem:[#allocation6 + $0x68] sm:$0xff] }
 0x7e2   : > { %2745 = vmatprep.subr.mxu0 %v3204_v24  ;;  %2777 = vmatprep.mubr.msk.f32.mxu0 %vm3205_vm2, %v3204_v24  ;;  %v2100_v27 = vld [vmem:[#allocation6 + $0x60] sm:$0xff]  ;;  %v2191_v28 = vld [vmem:[#allocation8 + $0x78] sm:$0xff]  ;;  %v2190_v29 = vld [vmem:[#allocation8 + $0x70] sm:$0xff] }
 0x7e3   : > { %2746 = vmatpush3.msra.mxu0 %v2103_v33  ;;  %2780 = vmatprep.subr.mxu1 %v3204_v24  ;;  %v2099_v30 = vld [vmem:[#allocation6 + $0x58] sm:$0xff]  ;;  %v2189_v31 = vld [vmem:[#allocation8 + $0x68] sm:$0xff]  ;;  %v2098_v32 = vld [vmem:[#allocation6 + $0x50] sm:$0xff] }
 0x7e4   : > { %2747 = vmatprep.subr.mxu0 %v3204_v24  ;;  %2812 = vmatprep.mubr.msk.f32.mxu1 %vm3205_vm2, %v3204_v24  ;;  %v2188_v34 = vld [vmem:[#allocation8 + $0x60] sm:$0xff]  ;;  %v2097_v35 = vld [vmem:[#allocation6 + $0x48] sm:$0xff]  ;;  %v2187_v36 = vld [vmem:[#allocation8 + $0x58] sm:$0xff] }
 0x7e5   : > { %2748 = vmatpush3.msra.mxu0 %v2102_v25  ;;  %2781 = vmatpush3.msra.mxu1 %v2191_v28  ;;  %v2096_v37 = vld [vmem:[#allocation6 + $0x40] sm:$0xff]  ;;  %v2186_v38 = vld [vmem:[#allocation8 + $0x50] sm:$0xff]  ;;  %v2095_v39 = vld [vmem:[#allocation6 + $0x38] sm:$0xff] }
 0x7e6   : > { %2749 = vmatprep.subr.mxu0 %v3204_v24  ;;  %2782 = vmatprep.subr.mxu1 %v3204_v24  ;;  %v2185_v40 = vld [vmem:[#allocation8 + $0x48] sm:$0xff]  ;;  %v2094_v41 = vld [vmem:[#allocation6 + $0x30] sm:$0xff]  ;;  %v2092_v43 = vld [vmem:[#allocation6 + $0x20] sm:$0xff] }
 0x7e7   : > { %2750 = vmatpush3.msra.mxu0 %v2101_v26  ;;  %2783 = vmatpush3.msra.mxu1 %v2190_v29  ;;  %v2093_v42 = vld [vmem:[#allocation6 + $0x28] sm:$0xff]  ;;  %v2091_v44 = vld [vmem:[#allocation6 + $0x18] sm:$0xff]  ;;  %v2090_v45 = vld [vmem:[#allocation6 + $0x10] sm:$0xff] }
 0x7e8   : > { %2751 = vmatprep.subr.mxu0 %v3204_v24  ;;  %2784 = vmatprep.subr.mxu1 %v3204_v24  ;;  %v2089_v46 = vld [vmem:[#allocation6 + $0x8] sm:$0xff]  ;;  %v2088_v47 = vld [vmem:[#allocation6] sm:$0xff]  ;;  %v2087_v48 = vld [vmem:[#allocation2] ss:$8 sm:$0x1] }
 0x7e9   : > { %2752 = vmatpush3.msra.mxu0 %v2100_v27  ;;  %2785 = vmatpush3.msra.mxu1 %v2189_v31  ;;  %v2184_v49 = vld [vmem:[#allocation8 + $0x40] sm:$0xff]  ;;  %v2183_v50 = vld [vmem:[#allocation8 + $0x38] sm:$0xff]  ;;  %v2182_v51 = vld [vmem:[#allocation8 + $0x30] sm:$0xff] }
 0x7ea   : > { %2753 = vmatprep.subr.mxu0 %v3204_v24  ;;  %2786 = vmatprep.subr.mxu1 %v3204_v24  ;;  %v2181_v53 = vld [vmem:[#allocation8 + $0x28] sm:$0xff]  ;;  %v2180_v54 = vld [vmem:[#allocation8 + $0x20] sm:$0xff]  ;;  %v2179_v55 = vld [vmem:[#allocation8 + $0x18] sm:$0xff] }
 0x7eb   : > { %2754 = vmatpush3.msra.mxu0 %v2099_v30  ;;  %2787 = vmatpush3.msra.mxu1 %v2188_v34  ;;  %v2178_v56 = vld [vmem:[#allocation8 + $0x10] sm:$0xff]  ;;  %v2177_v57 = vld [vmem:[#allocation8 + $0x8] sm:$0xff]  ;;  %v2176_v58 = vld [vmem:[#allocation8] sm:$0xff] }
 0x7ec   : > { %2755 = vmatprep.subr.mxu0 %v3204_v24  ;;  %2788 = vmatprep.subr.mxu1 %v3204_v24  ;;  %v2104_v59 = vld [vmem:[%s3831_s30] sm:$0x1] }
 0x7ed   : > { %2756 = vmatpush3.msra.mxu0 %v2098_v32  ;;  %2789 = vmatpush3.msra.mxu1 %v2187_v36  ;;  %v2192_v63 = vld [vmem:[%s3832_s0] sm:$0x1] }
 0x7ee   : > { %2757 = vmatprep.subr.mxu0 %v3204_v24  ;;  %2790 = vmatprep.subr.mxu1 %v3204_v24 }
 0x7ef   : > { %2758 = vmatpush3.msra.mxu0 %v2097_v35  ;;  %2791 = vmatpush3.msra.mxu1 %v2186_v38 }
 0x7f0   : > { %2759 = vmatprep.subr.mxu0 %v3204_v24  ;;  %2792 = vmatprep.subr.mxu1 %v3204_v24 }
 0x7f1   : > { %2760 = vmatpush3.msra.mxu0 %v2096_v37  ;;  %2793 = vmatpush3.msra.mxu1 %v2185_v40 }
 0x7f2   : > { %2761 = vmatprep.subr.mxu0 %v3204_v24  ;;  %2794 = vmatprep.subr.mxu1 %v3204_v24 }
 0x7f3   : > { %2762 = vmatpush3.msra.mxu0 %v2095_v39  ;;  %2795 = vmatpush3.msra.mxu1 %v2184_v49 }
 0x7f4   : > { %2763 = vmatprep.subr.mxu0 %v3204_v24  ;;  %2796 = vmatprep.subr.mxu1 %v3204_v24 }
 0x7f5   : > { %2764 = vmatpush3.msra.mxu0 %v2094_v41  ;;  %2797 = vmatpush3.msra.mxu1 %v2183_v50 }
 0x7f6   : > { %2765 = vmatprep.subr.mxu0 %v3204_v24  ;;  %2798 = vmatprep.subr.mxu1 %v3204_v24 }
 0x7f7   : > { %2766 = vmatpush3.msra.mxu0 %v2093_v42  ;;  %2799 = vmatpush3.msra.mxu1 %v2182_v51 }
 0x7f8   : > { %2767 = vmatprep.subr.mxu0 %v3204_v24  ;;  %2800 = vmatprep.subr.mxu1 %v3204_v24 }
 0x7f9   : > { %2768 = vmatpush3.msra.mxu0 %v2092_v43  ;;  %2801 = vmatpush3.msra.mxu1 %v2181_v53 }
 0x7fa   : > { %2769 = vmatprep.subr.mxu0 %v3204_v24  ;;  %2802 = vmatprep.subr.mxu1 %v3204_v24 }
 0x7fb   : > { %2770 = vmatpush3.msra.mxu0 %v2091_v44  ;;  %2803 = vmatpush3.msra.mxu1 %v2180_v54 }
 0x7fc   : > { %2771 = vmatprep.subr.mxu0 %v3204_v24  ;;  %2804 = vmatprep.subr.mxu1 %v3204_v24 }
 0x7fd   : > { %2772 = vmatpush3.msra.mxu0 %v2090_v45  ;;  %2805 = vmatpush3.msra.mxu1 %v2179_v55 }
 0x7fe   : > { %2773 = vmatprep.subr.mxu0 %v3204_v24  ;;  %2806 = vmatprep.subr.mxu1 %v3204_v24 }
 0x7ff   : > { %2774 = vmatpush3.msra.mxu0 %v2089_v46  ;;  %2807 = vmatpush3.msra.mxu1 %v2178_v56 }
 0x800   : > { %2775 = vmatprep.subr.mxu0 %v3204_v24  ;;  %2808 = vmatprep.subr.mxu1 %v3204_v24 }
 0x801   : > { %2776 = vmatpush3.msra.mxu0 %v2088_v47  ;;  %2809 = vmatpush3.msra.mxu1 %v2177_v57 }
 0x802   : > { %2778 = vmatmul.mubr.f32.vlgmr.msra.gmra.mxu0 %v2087_v48  ;;  %2810 = vmatprep.subr.mxu1 %v3204_v24 }
 0x803   : > { %2811 = vmatpush3.msra.mxu1 %v2176_v58 }
 0x8c2   : > { %v2171_v60 = vpop.f32.mrf.mxu0 }
 0x8c3   : > { %v2172_v61 = vadd.f32 %v2171_v60, %v2104_v59 }
 0x8c4   : > { %v2779_v62 = vpop.f32.mrf.mxu0 }
 0x8c5   : > { %3038 = vtanh.f32 %v2172_v61 }
 0x8d2   : > { %v3039_v52 = vpop.eup %3038 }
 0x8d3   : > { %2813 = vmatmul.mubr.f32.vlgmr.msra.gmra.mxu1 %v3039_v52 }
 0x993   : > { %v2259_v0 = vpop.f32.mrf.mxu1 }
 0x994   : > { %v2260_v1 = vadd.f32 %v2259_v0, %v2192_v63 }
 0x995   : > { %v2814_v2 = vpop.f32.mrf.mxu1 }
 0x996   : > { %2263 = vst [vmem:[%s3834_s13] sm:$0x1] %v2260_v1 }
 0x997 PF: > { %s3835_s23 = sld [smem:[#allocation17_spill]] }
 0x998   : > { %s3836_s27 = sld [smem:[#allocation13_spill]] }
 0x999   : > { %s3837_s28 = sld [smem:[#allocation14_spill]] }
 0x99a   : > { %s3838_s29 = sld [smem:[#allocation20_spill]] }
 0x99b   : > { %s3839_s30 = sld [smem:[#allocation15_spill]] }
 0x99c   : > { %s3840_s0 = sld [smem:[#allocation16_spill]] }
 0x99d   : > { %s32_s20 = sadd.s32 1, %s3835_s23   ;;  %s3841_s19 = sld [smem:[#allocation18_spill]] }
 0x99e   : > { %p29_p7 = scmp.ge.s32.totalorder %s32_s20, 6   ;;  %s3842_s1 = sld [smem:[#allocation19_spill]] }
 0x9a0   :  { %31 = sbr.rel (!%p29_p7) target bundleno = 23 (0x17), region = 223 }
 0x9a5   :  { %2281 = vsyncpa [#allocation5], 1 }
 0x9a6   :  { %2283 = vsyncpa [#allocation5 + $0x1], 1 }
 0x9a7   :  { %2284 = vsyncpa [#allocation7], 1 }
 0x9a8   :  { %2285 = vsyncmov [#allocation3] }
 0x9ab   :  { %s2286_s10 = vpop.sfrf %2285 }
 0x9ac   :  { %p2599_p9 = scmp.ne.s32.totalorder %s2286_s10, 0 }
 0x9ae   :  { %2290 = shalt.err (%p2599_p9)  }

</bundles_post_ra>
